<compile_context>
chip_gen: v7x
topology: tpu7x:2x2x1
jax: 0.10.0
libtpu: 0.0.40
codegen_flags: <defaults>
</compile_context>

<pallas_src>
import math
import numpy as np
import jax
import jax.numpy as jnp
from jax import lax
from jax.experimental import pallas as pl
from jax.experimental.pallas import tpu as pltpu

# ----------------------- configuration (small shapes) -----------------------
FFT_SIZE = 128                     # fft_sizes
MEL_BINS = 16                      # mel_bins
MFCC_BINS = 8                      # mfcc_bins
SAMPLING_RATE = 16000              # sampling_rate
BLOCK_SIZE = 64                    # block_size
SIGNAL_LENGTH = 1024               # signal_length
BATCH = 2

HOP = FFT_SIZE // 2                # torchaudio default hop_length = win_length // 2
N_FREQ = FFT_SIZE // 2 + 1         # 65 onesided bins (zero-padded to 128 in consts)
N_OUT = SIGNAL_LENGTH // BLOCK_SIZE  # 16 frames kept by the slice
PAD = FFT_SIZE // 2                # center (reflect) padding
LOG_OFFSET = 1e-6                  # torchaudio MFCC log_mels offset
LN_EPS = 1e-5                      # nn.LayerNorm default eps

assert HOP == BLOCK_SIZE, "frame hop must match block_size for this config"
assert MEL_BINS == N_OUT, "constant packing below stacks (16,8) matrices"


# ------------------------- deterministic parameters -------------------------
def _hann_window(n):
    # torch.hann_window(n, periodic=True)
    i = np.arange(n, dtype=np.float64)
    return 0.5 - 0.5 * np.cos(2.0 * np.pi * i / n)


def _dft_matrix_fused(n_fft, n_freq):
    # Fused [cos | sin] windowed DFT matrix, each half zero-padded 65 -> 128 cols.
    n = np.arange(n_fft, dtype=np.float64)[:, None]            # (n_fft, 1)
    k = np.arange(n_freq, dtype=np.float64)[None, :]           # (1, n_freq)
    ang = 2.0 * np.pi * n * k / n_fft
    w = _hann_window(n_fft)[:, None]
    cos_m = w * np.cos(ang)                                    # (n_fft, n_freq)
    sin_m = -w * np.sin(ang)                                   # (n_fft, n_freq)
    cos_p = np.zeros((n_fft, n_fft), dtype=np.float64)
    sin_p = np.zeros((n_fft, n_fft), dtype=np.float64)
    cos_p[:, :n_freq] = cos_m
    sin_p[:, :n_freq] = sin_m
    return np.concatenate([cos_p, sin_p], axis=1).astype(np.float32)  # (128, 256)


def _mel_fbank_padded(n_freq, n_mels, sr, n_freq_pad):
    # torchaudio.functional.melscale_fbanks (htk, norm=None); rows padded w/ zeros.
    def hz_to_mel(f):
        return 2595.0 * np.log10(1.0 + f / 700.0)

    def mel_to_hz(m):
        return 700.0 * (10.0 ** (m / 2595.0) - 1.0)

    all_freqs = np.linspace(0.0, sr // 2, n_freq)
    m_pts = np.linspace(hz_to_mel(0.0), hz_to_mel(sr // 2), n_mels + 2)
    f_pts = mel_to_hz(m_pts)
    f_diff = f_pts[1:] - f_pts[:-1]                            # (n_mels+1,)
    slopes = f_pts[None, :] - all_freqs[:, None]               # (n_freq, n_mels+2)
    down = -slopes[:, :-2] / f_diff[:-1]
    up = slopes[:, 2:] / f_diff[1:]
    fb = np.maximum(0.0, np.minimum(down, up))                 # (n_freq, n_mels)
    out = np.zeros((n_freq_pad, n_mels), dtype=np.float32)     # padded freq bins = 0
    out[:n_freq, :] = fb
    return out                                                 # (128, n_mels)


def _dct_matrix(n_mfcc, n_mels):
    # torchaudio.functional.create_dct(n_mfcc, n_mels, norm="ortho") -> (n_mels, n_mfcc)
    n = np.arange(n_mels, dtype=np.float64)
    k = np.arange(n_mfcc, dtype=np.float64)[:, None]
    dct = np.cos(np.pi / n_mels * (n + 0.5) * k)               # (n_mfcc, n_mels)
    dct[0] *= 1.0 / math.sqrt(2.0)
    dct *= math.sqrt(2.0 / n_mels)
    return dct.T.astype(np.float32)                            # (n_mels, n_mfcc)


# ------------------------------- Pallas kernel -------------------------------
def _mfcc_ln_kernel(frames_ref, dft_ref, mel2_ref, sp_ref, out_ref):
    bsz = out_ref.shape[0]

    # 1) Windowed DFT: single fused [cos|sin] matmul.  (M,128) x (128,256)
    x = frames_ref[...]                                        # (M, 128)
    spec = jnp.dot(x, dft_ref[...],
                   preferred_element_type=jnp.float32,
                   precision=lax.Precision.HIGHEST)            # (M, 256)

    # 2) Power spectrum fused into the mel matmul: (re^2 + im^2) @ mel
    #    == (spec*spec) @ [mel; mel].  K=256, lane-dense operands.
    sq = spec * spec                                           # (M, 256)
    mel = jnp.dot(sq, mel2_ref[...],
                  preferred_element_type=jnp.float32,
                  precision=lax.Precision.HIGHEST)             # (M, 16)

    # 3) log-mel + ortho DCT.
    logmel = jnp.log(mel + LOG_OFFSET)                         # (M, 16)
    mfcc = jnp.dot(logmel, sp_ref[0],                          # dct (16, 8)
                   preferred_element_type=jnp.float32,
                   precision=lax.Precision.HIGHEST)            # (M, 8)

    # 4) Grouped LayerNorm over the joint (frames, mfcc) dims per sample.
    #    (M, 8) -> (B, 16, 8) is a sublane-only split (no lane movement).
    g = mfcc.reshape(bsz, N_OUT, MFCC_BINS)                    # (B, 16, 8)
    inv_n = 1.0 / float(N_OUT * MFCC_BINS)
    s = jnp.sum(jnp.sum(g, axis=2, keepdims=True), axis=1, keepdims=True)
    mean = s * inv_n                                           # (B, 1, 1)
    cent = g - mean
    ss = jnp.sum(jnp.sum(cent * cent, axis=2, keepdims=True), axis=1,
                 keepdims=True)
    var = ss * inv_n                                           # (B, 1, 1)
    y = cent * lax.rsqrt(var + LN_EPS)

    # 5) Affine (weight/bias packed at sp[1], sp[2] as (16, 8)).
    out_ref[...] = y * sp_ref[1][None, :, :] + sp_ref[2][None, :, :]


def mfcc_encoder_forward(audio, dft_m, mel2, sp):
    bsz, t = audio.shape
    assert t == SIGNAL_LENGTH
    m_rows = bsz * N_OUT

    # Wrapper-side glue (cheap XLA layout ops, no gathers):
    # reflect center-padding, then overlapping 128-sample frames at hop 64
    # built from two aligned 64-wide slabs.
    padded = jnp.pad(audio, ((0, 0), (PAD, PAD)), mode="reflect")   # (B, 1152)
    first = padded[:, :N_OUT * HOP].reshape(bsz, N_OUT, HOP)        # samples [f*64, f*64+64)
    second = padded[:, HOP:HOP + N_OUT * HOP].reshape(bsz, N_OUT, HOP)
    frames = jnp.concatenate([first, second], axis=-1)              # (B, 16, 128)
    frames = frames.reshape(m_rows, FFT_SIZE)                       # (32, 128)

    out = pl.pallas_call(
        _mfcc_ln_kernel,
        out_shape=jax.ShapeDtypeStruct((bsz, N_OUT, MFCC_BINS), jnp.float32),
        grid=(1,),
        in_specs=[
            pl.BlockSpec((m_rows, FFT_SIZE), lambda i: (0, 0)),          # frames
            pl.BlockSpec((FFT_SIZE, 2 * FFT_SIZE), lambda i: (0, 0)),    # [cos|sin] DFT
            pl.BlockSpec((2 * FFT_SIZE, MEL_BINS), lambda i: (0, 0)),    # [mel; mel]
            pl.BlockSpec((3, N_OUT, MFCC_BINS), lambda i: (0, 0, 0)),    # dct / ln_w / ln_b
        ],
        out_specs=pl.BlockSpec((bsz, N_OUT, MFCC_BINS), lambda i: (0, 0, 0)),
        compiler_params=pltpu.CompilerParams(
            dimension_semantics=("arbitrary",)),
    )(frames, dft_m, mel2, sp)
    return out                                                       # (B, 16, 8)


# ------------------------------------ main -----------------------------------
if __name__ == "__main__":
    # Deterministic parameter construction (matches module __init__ shapes).
    dft_m = jnp.asarray(_dft_matrix_fused(FFT_SIZE, N_FREQ))             # (128, 256)
    mel_pad = _mel_fbank_padded(N_FREQ, MEL_BINS, SAMPLING_RATE, FFT_SIZE)  # (128, 16)
    mel2 = jnp.asarray(np.concatenate([mel_pad, mel_pad], axis=0))       # (256, 16)
    dct_m = _dct_matrix(MFCC_BINS, MEL_BINS)                             # (16, 8)
    # nn.LayerNorm([N_OUT, MFCC_BINS]) default init: weight=ones, bias=zeros.
    ln_w = np.ones((N_OUT, MFCC_BINS), np.float32)
    ln_b = np.zeros((N_OUT, MFCC_BINS), np.float32)
    sp = jnp.asarray(np.stack([dct_m, ln_w, ln_b], axis=0))              # (3, 16, 8)

    key = jax.random.PRNGKey(0)
    audio = jax.random.normal(key, (BATCH, SIGNAL_LENGTH), dtype=jnp.float32)

    out = mfcc_encoder_forward(audio, dft_m, mel2, sp)
    out = jax.block_until_ready(out)
    assert out.shape == (BATCH, N_OUT, MFCC_BINS)
    assert bool(jnp.all(jnp.isfinite(out)))
    print("KERNEL_OK")
</pallas_src>

<mosaic_0001>
module attributes {stable_mosaic.version = 11 : i64} {
  func.func @_mfcc_ln_kernel(%arg0: i32, %arg1: memref<32x128xf32, #tpu.memory_space<vmem>>, %arg2: memref<128x256xf32, #tpu.memory_space<vmem>>, %arg3: memref<256x16xf32, #tpu.memory_space<vmem>>, %arg4: memref<3x16x8xf32, #tpu.memory_space<vmem>>, %arg5: memref<2x16x8xf32, #tpu.memory_space<vmem>>) attributes {dimension_semantics = [#tpu.dimension_semantics<arbitrary>], iteration_bounds = array<i64: 1>, scalar_prefetch = 0 : i64, scratch_operands = 0 : i64, tpu.core_type = #tpu.core_type<tc>, window_params = [{pipeline_mode = #tpu.pipeline_mode<synchronous>, transform_indices = @transform_0, window_bounds = array<i64: 32, 128>}, {pipeline_mode = #tpu.pipeline_mode<synchronous>, transform_indices = @transform_1, window_bounds = array<i64: 128, 256>}, {pipeline_mode = #tpu.pipeline_mode<synchronous>, transform_indices = @transform_2, window_bounds = array<i64: 256, 16>}, {pipeline_mode = #tpu.pipeline_mode<synchronous>, transform_indices = @transform_3, window_bounds = array<i64: 3, 16, 8>}, {pipeline_mode = #tpu.pipeline_mode<synchronous>, transform_indices = @transform_4, window_bounds = array<i64: 2, 16, 8>}]} {
    %c0 = arith.constant 0 : index
    %c0_0 = arith.constant 0 : index
    %0 = vector.load %arg1[%c0, %c0_0] : memref<32x128xf32, #tpu.memory_space<vmem>>, vector<32x128xf32>
    %c0_1 = arith.constant 0 : index
    %c0_2 = arith.constant 0 : index
    %1 = vector.load %arg2[%c0_1, %c0_2] : memref<128x256xf32, #tpu.memory_space<vmem>>, vector<128x256xf32>
    %cst = arith.constant dense<0.000000e+00> : vector<32x256xf32>
    %2 = tpu.matmul %0, %1, %cst {dimension_numbers = #tpu.dot_dimension_numbers<[1], [0], [0], [1], [0, 0, 1, 1], [], []>, precision = #tpu.contract_precision<fp32>} : vector<32x128xf32>, vector<128x256xf32>, vector<32x256xf32> -> vector<32x256xf32>
    %3 = arith.mulf %2, %2 : vector<32x256xf32>
    %c0_3 = arith.constant 0 : index
    %c0_4 = arith.constant 0 : index
    %4 = vector.load %arg3[%c0_3, %c0_4] : memref<256x16xf32, #tpu.memory_space<vmem>>, vector<256x16xf32>
    %cst_5 = arith.constant dense<0.000000e+00> : vector<32x16xf32>
    %5 = tpu.matmul %3, %4, %cst_5 {dimension_numbers = #tpu.dot_dimension_numbers<[1], [0], [0], [1], [0, 0, 1, 1], [], []>, precision = #tpu.contract_precision<fp32>} : vector<32x256xf32>, vector<256x16xf32>, vector<32x16xf32> -> vector<32x16xf32>
    %cst_6 = arith.constant 9.99999997E-7 : f32
    %6 = vector.broadcast %cst_6 : f32 to vector<32x16xf32>
    %7 = arith.addf %5, %6 : vector<32x16xf32>
    %8 = math.log %7 : vector<32x16xf32>
    %c0_7 = arith.constant 0 : index
    %c0_8 = arith.constant 0 : index
    %c0_9 = arith.constant 0 : index
    %9 = vector.load %arg4[%c0_7, %c0_8, %c0_9] : memref<3x16x8xf32, #tpu.memory_space<vmem>>, vector<1x16x8xf32>
    %10 = vector.shape_cast %9 : vector<1x16x8xf32> to vector<16x8xf32>
    %cst_10 = arith.constant dense<0.000000e+00> : vector<32x8xf32>
    %11 = tpu.matmul %8, %10, %cst_10 {dimension_numbers = #tpu.dot_dimension_numbers<[1], [0], [0], [1], [0, 0, 1, 1], [], []>, precision = #tpu.contract_precision<fp32>} : vector<32x16xf32>, vector<16x8xf32>, vector<32x8xf32> -> vector<32x8xf32>
    %12 = vector.shape_cast %11 : vector<32x8xf32> to vector<2x16x8xf32>
    %cst_11 = arith.constant dense<0.000000e+00> : vector<2x16xf32>
    %13 = vector.multi_reduction <add>, %12, %cst_11 [2] : vector<2x16x8xf32> to vector<2x16xf32>
    %14 = vector.shape_cast %13 : vector<2x16xf32> to vector<2x16x1xf32>
    %cst_12 = arith.constant dense<0.000000e+00> : vector<2x1xf32>
    %15 = vector.multi_reduction <add>, %14, %cst_12 [1] : vector<2x16x1xf32> to vector<2x1xf32>
    %16 = vector.shape_cast %15 : vector<2x1xf32> to vector<2x1x1xf32>
    %cst_13 = arith.constant 7.812500e-03 : f32
    %17 = vector.broadcast %cst_13 : f32 to vector<2x1x1xf32>
    %18 = arith.mulf %16, %17 : vector<2x1x1xf32>
    %19 = vector.broadcast %18 : vector<2x1x1xf32> to vector<2x16x8xf32>
    %20 = arith.subf %12, %19 : vector<2x16x8xf32>
    %21 = arith.mulf %20, %20 : vector<2x16x8xf32>
    %cst_14 = arith.constant dense<0.000000e+00> : vector<2x16xf32>
    %22 = vector.multi_reduction <add>, %21, %cst_14 [2] : vector<2x16x8xf32> to vector<2x16xf32>
    %23 = vector.shape_cast %22 : vector<2x16xf32> to vector<2x16x1xf32>
    %cst_15 = arith.constant dense<0.000000e+00> : vector<2x1xf32>
    %24 = vector.multi_reduction <add>, %23, %cst_15 [1] : vector<2x16x1xf32> to vector<2x1xf32>
    %25 = vector.shape_cast %24 : vector<2x1xf32> to vector<2x1x1xf32>
    %cst_16 = arith.constant 7.812500e-03 : f32
    %26 = vector.broadcast %cst_16 : f32 to vector<2x1x1xf32>
    %27 = arith.mulf %25, %26 : vector<2x1x1xf32>
    %cst_17 = arith.constant 9.99999974E-6 : f32
    %28 = vector.broadcast %cst_17 : f32 to vector<2x1x1xf32>
    %29 = arith.addf %27, %28 : vector<2x1x1xf32>
    %30 = math.rsqrt %29 : vector<2x1x1xf32>
    %31 = vector.broadcast %30 : vector<2x1x1xf32> to vector<2x16x8xf32>
    %32 = arith.mulf %20, %31 : vector<2x16x8xf32>
    %c1 = arith.constant 1 : index
    %c0_18 = arith.constant 0 : index
    %c0_19 = arith.constant 0 : index
    %33 = vector.load %arg4[%c1, %c0_18, %c0_19] : memref<3x16x8xf32, #tpu.memory_space<vmem>>, vector<1x16x8xf32>
    %34 = vector.shape_cast %33 : vector<1x16x8xf32> to vector<16x8xf32>
    %35 = vector.shape_cast %34 : vector<16x8xf32> to vector<1x16x8xf32>
    %36 = vector.broadcast %35 : vector<1x16x8xf32> to vector<2x16x8xf32>
    %37 = arith.mulf %32, %36 : vector<2x16x8xf32>
    %c2 = arith.constant 2 : index
    %c0_20 = arith.constant 0 : index
    %c0_21 = arith.constant 0 : index
    %38 = vector.load %arg4[%c2, %c0_20, %c0_21] : memref<3x16x8xf32, #tpu.memory_space<vmem>>, vector<1x16x8xf32>
    %39 = vector.shape_cast %38 : vector<1x16x8xf32> to vector<16x8xf32>
    %40 = vector.shape_cast %39 : vector<16x8xf32> to vector<1x16x8xf32>
    %41 = vector.broadcast %40 : vector<1x16x8xf32> to vector<2x16x8xf32>
    %42 = arith.addf %37, %41 : vector<2x16x8xf32>
    %c0_22 = arith.constant 0 : index
    %c0_23 = arith.constant 0 : index
    %c0_24 = arith.constant 0 : index
    %43 = vector.load %arg5[%c0_22, %c0_23, %c0_24] : memref<2x16x8xf32, #tpu.memory_space<vmem>>, vector<2x16x8xf32>
    tpu.vector_store %arg5[%c0_22, %c0_23, %c0_24], %42 {strides = array<i32>} : memref<2x16x8xf32, #tpu.memory_space<vmem>>, vector<2x16x8xf32>,
    return
  }
  func.func @transform_0(%arg0: i32) -> (i32, i32) {
    %c0_i32 = arith.constant 0 : i32
    %c0_i32_0 = arith.constant 0 : i32
    %c0_i32_1 = arith.constant 0 : i32
    return %c0_i32, %c0_i32_0 : i32, i32
  }
  func.func @transform_1(%arg0: i32) -> (i32, i32) {
    %c0_i32 = arith.constant 0 : i32
    %c0_i32_0 = arith.constant 0 : i32
    %c0_i32_1 = arith.constant 0 : i32
    return %c0_i32, %c0_i32_0 : i32, i32
  }
  func.func @transform_2(%arg0: i32) -> (i32, i32) {
    %c0_i32 = arith.constant 0 : i32
    %c0_i32_0 = arith.constant 0 : i32
    %c0_i32_1 = arith.constant 0 : i32
    return %c0_i32, %c0_i32_0 : i32, i32
  }
  func.func @transform_3(%arg0: i32) -> (i32, i32, i32) {
    %c0_i32 = arith.constant 0 : i32
    %c0_i32_0 = arith.constant 0 : i32
    %c0_i32_1 = arith.constant 0 : i32
    %c0_i32_2 = arith.constant 0 : i32
    return %c0_i32, %c0_i32_0, %c0_i32_1 : i32, i32, i32
  }
  func.func @transform_4(%arg0: i32) -> (i32, i32, i32) {
    %c0_i32 = arith.constant 0 : i32
    %c0_i32_0 = arith.constant 0 : i32
    %c0_i32_1 = arith.constant 0 : i32
    %c0_i32_2 = arith.constant 0 : i32
    return %c0_i32, %c0_i32_0, %c0_i32_1 : i32, i32, i32
  }
}

</mosaic_0001>

<bundles_post_ra>
// kernel: tpu_custom_call.1
= control target key start
LH: loop header
LB: loop body
LE: loop exit
PB: predicated region body
PF: predicated region fallthrough
CT: control target
= control target key end

     0   :  { %v5465_v3 = vmov 0.0   ;;  %vm2135_vm0 = vcmask 130048   ;;  %vm2736_vm1 = vcmask 64512   ;;  %s5424_s1 = inlined_call_operand.vmem [shape: f32[128,256], index: 1, kind: input, shape index: {}]   ;;  %s5425_s0 = inlined_call_operand.vmem [shape: f32[32,128], index: 0, kind: input, shape index: {}]   ;;  %s5426_s2 = inlined_call_operand.vmem [shape: f32[256,16], index: 2, kind: input, shape index: {}]   ;;  %s5427_s3 = inlined_call_operand.vmem [shape: f32[3,16,8], index: 3, kind: input, shape index: {}]   ;;  %s5428_s4 = inlined_call_operand.vmem [shape: f32[2,16,8], index: 4, kind: output, shape index: {}]  }
   0x1   :  { %v3705_v0 = vld [vmem:[%s5424_s1 + $0x8] sm:$0xff]  ;;  %v3710_v1 = vld [vmem:[%s5424_s1 + $0x18] sm:$0xff]  ;;  %v3715_v2 = vld [vmem:[%s5424_s1] sm:$0xff]  ;;  %418 = vmatprep.mubr.f32.mxu0 %v5465_v3  ;;  %149 = vmatprep.mubr.f32.mxu1 %v5465_v3 }
   0x2   :  { %v5475_v4 = vand.u32 4294901760, %v3705_v0  ;;  %v5473_v5 = vand.u32 4294901760, %v3710_v1  ;;  %v3724_v6 = vld [vmem:[%s5424_s1 + $0x10] sm:$0xff]  ;;  %v5469_v7 = vand.u32 4294901760, %v3715_v2  ;;  %v3730_v8 = vld [vmem:[%s5424_s1 + $0x28] sm:$0xff]  ;;  %v3735_v9 = vld [vmem:[%s5424_s1 + $0x38] sm:$0xff] }
   0x3   :  { %v5467_v10 = vand.u32 4294901760, %v3724_v6  ;;  %v5464_v11 = vand.u32 4294901760, %v3730_v8  ;;  %v5461_v12 = vand.u32 4294901760, %v3735_v9  ;;  %v3743_v13 = vld [vmem:[%s5424_s1 + $0x20] sm:$0xff]  ;;  %v3748_v14 = vld [vmem:[%s5424_s1 + $0x30] sm:$0xff]  ;;  %v3821_v39 = vld [vmem:[%s5424_s1 + $0x48] sm:$0xff] }
   0x4   :  { %v3753_v15 = vsub.f32 %v3705_v0, %v5475_v4  ;;  %v3758_v16 = vsub.f32 %v3710_v1, %v5473_v5  ;;  %v3763_v17 = vsub.f32 %v3715_v2, %v5469_v7  ;;  %v5458_v18 = vand.u32 4294901760, %v3743_v13  ;;  %v3826_v40 = vld [vmem:[%s5424_s1 + $0x58] sm:$0xff]  ;;  %v3834_v45 = vld [vmem:[%s5424_s1 + $0x40] sm:$0xff]  ;;  %v3842_v50 = vld [vmem:[%s5424_s1 + $0x50] sm:$0xff] }
   0x5   :  { %v3769_v19 = vsub.f32 %v3724_v6, %v5467_v10  ;;  %v3774_v20 = vsub.f32 %v3730_v8, %v5464_v11  ;;  %v3779_v21 = vsub.f32 %v3735_v9, %v5461_v12  ;;  %v5457_v22 = vand.u32 4294901760, %v3748_v14  ;;  %v3847_v51 = vld [vmem:[%s5424_s1 + $0x68] sm:$0xff]  ;;  %v3854_v56 = vld [vmem:[%s5424_s1 + $0x78] sm:$0xff]  ;;  %v3859_v57 = vld [vmem:[%s5424_s1 + $0x60] sm:$0xff] }
   0x6   :  { %v5455_v23 = vand.u32 4294901760, %v3753_v15  ;;  %v5451_v24 = vand.u32 4294901760, %v3758_v16  ;;  %v5449_v25 = vand.u32 4294901760, %v3763_v17  ;;  %v3788_v26 = vsub.f32 %v3743_v13, %v5458_v18  ;;  %5621 = vst [vmem:[#allocation2_spill] sm:$0xff] %v3859_v57  ;;  %v4041_v12 = vld [vmem:[%s5424_s1 + $0xc8] sm:$0xff]  ;;  %v4071_v5 = vld [vmem:[%s5424_s1 + $0xc0] sm:$0xff] }
   0x7   :  { %v5448_v27 = vand.u32 4294901760, %v3769_v19  ;;  %v5447_v28 = vand.u32 4294901760, %v3774_v20  ;;  %v5446_v29 = vand.u32 4294901760, %v3779_v21  ;;  %v3796_v30 = vsub.f32 %v3748_v14, %v5457_v22  ;;  %5631 = vst [vmem:[#allocation12_spill] sm:$0xff] %v4041_v12  ;;  %5633 = vst [vmem:[#allocation14_spill] sm:$0xff] %v4071_v5 }
   0x8   :  { %v197_v31 = vsub.f32 %v3753_v15, %v5455_v23  ;;  %v209_v32 = vsub.f32 %v3758_v16, %v5451_v24  ;;  %v203_v33 = vsub.f32 %v3763_v17, %v5449_v25  ;;  %v5443_v34 = vand.u32 4294901760, %v3788_v26 }
   0x9   :  { %v215_v35 = vsub.f32 %v3769_v19, %v5448_v27  ;;  %v221_v36 = vsub.f32 %v3774_v20, %v5447_v28  ;;  %v233_v37 = vsub.f32 %v3779_v21, %v5446_v29  ;;  %v5442_v38 = vand.u32 4294901760, %v3796_v30 }
   0xa   :  { %v198_v41 = vand.u32 4294901760, %v197_v31  ;;  %v210_v42 = vand.u32 4294901760, %v209_v32  ;;  %v204_v43 = vand.u32 4294901760, %v203_v33  ;;  %v227_v44 = vsub.f32 %v3788_v26, %v5443_v34  ;;  %v3877_v33 = vld [vmem:[%s5424_s1 + $0x70] sm:$0xff] }
   0xb   :  { %v216_v46 = vand.u32 4294901760, %v215_v35  ;;  %v222_v47 = vand.u32 4294901760, %v221_v36  ;;  %v234_v48 = vand.u32 4294901760, %v233_v37  ;;  %v239_v49 = vsub.f32 %v3796_v30, %v5442_v38  ;;  %5622 = vst [vmem:[#allocation3_spill] sm:$0xff] %v3877_v33 }
   0xc   :  { %v3227_v52 = vpack.c.bf16 %v210_v42, %v198_v41  ;;  %v228_v53 = vand.u32 4294901760, %v227_v44  ;;  %v5435_v54 = vand.u32 4294901760, %v3821_v39  ;;  %v5434_v55 = vand.u32 4294901760, %v3826_v40 }
   0xd   :  { %v3229_v58 = vpack.c.bf16 %v216_v46, %v204_v43  ;;  %v3231_v59 = vpack.c.bf16 %v234_v48, %v222_v47  ;;  %v240_v60 = vand.u32 4294901760, %v239_v49  ;;  %v5433_v61 = vand.u32 4294901760, %v3834_v45 }
   0xe   :  { %3228 = vmatprep.subr.bf16.mxu0 %v3227_v52  ;;  %v3865_v62 = vsub.f32 %v3821_v39, %v5435_v54  ;;  %v3870_v63 = vsub.f32 %v3826_v40, %v5434_v55  ;;  %v5432_v31 = vand.u32 4294901760, %v3842_v50  ;;  %v5431_v32 = vand.u32 4294901760, %v3847_v51 }
   0xf   :  { %3230 = vmatpush1.bf16.msra.mxu0 %v3229_v58  ;;  %v3233_v35 = vpack.c.bf16 %v240_v60, %v228_v53  ;;  %v3882_v36 = vsub.f32 %v3834_v45, %v5433_v61  ;;  %v5429_v37 = vand.u32 4294901760, %v3854_v56  ;;  %v5430_v41 = vand.u32 4294901760, %v3859_v57  ;;  %v3931_v61 = vld [vmem:[%s5424_s1 + $0x88] sm:$0xff] }
  0x10   :  { %3232 = vmatprep.subr.bf16.mxu0 %v3231_v59  ;;  %v5439_v42 = vand.u32 4294901760, %v3865_v62  ;;  %v5438_v43 = vand.u32 4294901760, %v3870_v63  ;;  %v3891_v44 = vsub.f32 %v3842_v50, %v5432_v31  ;;  %v3896_v46 = vsub.f32 %v3847_v51, %v5431_v32  ;;  %5623 = vst [vmem:[#allocation4_spill] sm:$0xff] %v3931_v61 }
  0x11   :  { %v5436_v47 = vand.u32 4294901760, %v3882_v36  ;;  %v3902_v48 = vsub.f32 %v3854_v56, %v5429_v37  ;;  %v5437_v49 = vand.u32 4294901760, %v3877_v33  ;;  %v3908_v52 = vsub.f32 %v3859_v57, %v5430_v41 }
  0x12   :  { %v245_v53 = vsub.f32 %v3865_v62, %v5439_v42  ;;  %v257_v58 = vsub.f32 %v3870_v63, %v5438_v43  ;;  %v5441_v59 = vand.u32 4294901760, %v3891_v44  ;;  %v5440_v60 = vand.u32 4294901760, %v3896_v46 }
  0x13   :  { %3234 = vmatpush1.bf16.msra.mxu0 %v3233_v35  ;;  %v251_v37 = vsub.f32 %v3882_v36, %v5436_v47  ;;  %v5444_v41 = vand.u32 4294901760, %v3902_v48  ;;  %v5445_v32 = vand.u32 4294901760, %v3908_v52  ;;  %v3926_v31 = vsub.f32 %v3877_v33, %v5437_v49  ;;  %v3942_v49 = vld [vmem:[%s5424_s1 + $0x98] sm:$0xff] }
  0x14   :  { %v246_v55 = vand.u32 4294901760, %v245_v53  ;;  %v258_v35 = vand.u32 4294901760, %v257_v58  ;;  %v263_v54 = vsub.f32 %v3891_v44, %v5441_v59  ;;  %v269_v47 = vsub.f32 %v3896_v46, %v5440_v60  ;;  %5624 = vst [vmem:[#allocation5_spill] sm:$0xff] %v3942_v49  ;;  %v3954_v60 = vld [vmem:[%s5424_s1 + $0x80] sm:$0xff]  ;;  %v3959_v59 = vld [vmem:[%s5424_s1 + $0x90] sm:$0xff] }
  0x15   :  { %v252_v43 = vand.u32 4294901760, %v251_v37  ;;  %v281_v42 = vsub.f32 %v3902_v48, %v5444_v41  ;;  %v275_v53 = vsub.f32 %v3908_v52, %v5445_v32  ;;  %v5450_v58 = vand.u32 4294901760, %v3926_v31  ;;  %5625 = vst [vmem:[#allocation6_spill] sm:$0xff] %v3954_v60  ;;  %5626 = vst [vmem:[#allocation7_spill] sm:$0xff] %v3959_v59  ;;  %v3965_v32 = vld [vmem:[%s5424_s1 + $0xa8] sm:$0xff] }
  0x16   :  { %v3235_v37 = vpack.c.bf16 %v258_v35, %v246_v55  ;;  %v264_v38 = vand.u32 4294901760, %v263_v54  ;;  %v270_v34 = vand.u32 4294901760, %v269_v47  ;;  %v5452_v41 = vand.u32 4294901760, %v3931_v61  ;;  %5627 = vst [vmem:[#allocation8_spill] sm:$0xff] %v3965_v32  ;;  %v3974_v54 = vld [vmem:[%s5424_s1 + $0xb8] sm:$0xff] }
  0x17   :  { %v282_v29 = vand.u32 4294901760, %v281_v42  ;;  %v276_v28 = vand.u32 4294901760, %v275_v53  ;;  %v287_v27 = vsub.f32 %v3926_v31, %v5450_v58  ;;  %v5453_v25 = vand.u32 4294901760, %v3942_v49  ;;  %5628 = vst [vmem:[#allocation9_spill] sm:$0xff] %v3974_v54  ;;  %v3986_v53 = vld [vmem:[%s5424_s1 + $0xa0] sm:$0xff] }
  0x18   :  { %3236 = vmatprep.subr.bf16.mxu0 %v3235_v37  ;;  %v3237_v55 = vpack.c.bf16 %v264_v38, %v252_v43  ;;  %v3979_v47 = vsub.f32 %v3931_v61, %v5452_v41  ;;  %v5454_v42 = vand.u32 4294901760, %v3954_v60  ;;  %v5456_v35 = vand.u32 4294901760, %v3959_v59  ;;  %5629 = vst [vmem:[#allocation10_spill] sm:$0xff] %v3986_v53 }
  0x19   :  { %v3239_v58 = vpack.c.bf16 %v282_v29, %v270_v34  ;;  %v288_v24 = vand.u32 4294901760, %v287_v27  ;;  %v3991_v38 = vsub.f32 %v3942_v49, %v5453_v25  ;;  %v5459_v43 = vand.u32 4294901760, %v3965_v32  ;;  %v4009_v34 = vld [vmem:[%s5424_s1 + $0xb0] sm:$0xff] }
  0x1a   :  { %3238 = vmatpush1.bf16.msra.mxu0 %v3237_v55  ;;  %v5460_v37 = vand.u32 4294901760, %v3979_v47  ;;  %v3998_v41 = vsub.f32 %v3954_v60, %v5454_v42  ;;  %v4003_v29 = vsub.f32 %v3959_v59, %v5456_v35  ;;  %v5462_v27 = vand.u32 4294901760, %v3974_v54  ;;  %5630 = vst [vmem:[#allocation11_spill] sm:$0xff] %v4009_v34 }
  0x1b   :  { %3240 = vmatprep.subr.bf16.mxu0 %v3239_v58  ;;  %v3241_v55 = vpack.c.bf16 %v288_v24, %v276_v28  ;;  %v5463_v25 = vand.u32 4294901760, %v3991_v38  ;;  %v4015_v42 = vsub.f32 %v3965_v32, %v5459_v43  ;;  %v5468_v23 = vand.u32 4294901760, %v3986_v53 }
  0x1c   :  { %v293_v35 = vsub.f32 %v3979_v47, %v5460_v37  ;;  %v5471_v22 = vand.u32 4294901760, %v3998_v41  ;;  %v5470_v18 = vand.u32 4294901760, %v4003_v29  ;;  %v4026_v24 = vsub.f32 %v3974_v54, %v5462_v27 }
  0x1d   :  { %v305_v28 = vsub.f32 %v3991_v38, %v5463_v25  ;;  %v5472_v58 = vand.u32 4294901760, %v4015_v42  ;;  %v5474_v43 = vand.u32 4294901760, %v4009_v34  ;;  %v4036_v37 = vsub.f32 %v3986_v53, %v5468_v23 }
  0x1e   :  { %3242 = vmatpush1.bf16.msra.mxu0 %v3241_v55  ;;  %v294_v27 = vand.u32 4294901760, %v293_v35  ;;  %v299_v25 = vsub.f32 %v3998_v41, %v5471_v22  ;;  %v311_v11 = vsub.f32 %v4003_v29, %v5470_v18  ;;  %v5476_v3 = vand.u32 4294901760, %v4026_v24  ;;  %v4062_v55 = vld [vmem:[%s5424_s1 + $0xd8] sm:$0xff] }
  0x1f   :  { %v306_v10 = vand.u32 4294901760, %v305_v28  ;;  %v317_v23 = vsub.f32 %v4015_v42, %v5472_v58  ;;  %v4057_v35 = vsub.f32 %v4009_v34, %v5474_v43  ;;  %5632 = vst [vmem:[#allocation13_spill] sm:$0xff] %v4062_v55  ;;  %v4076_v43 = vld [vmem:[%s5424_s1 + $0xd0] sm:$0xff]  ;;  %v4085_v58 = vld [vmem:[%s5424_s1 + $0xe8] sm:$0xff]  ;;  %v5637_v32 = vand.u32 4294901760, %v4041_v12 }
  0x20   :  { %v300_v18 = vand.u32 4294901760, %v299_v25  ;;  %v312_v22 = vand.u32 4294901760, %v311_v11  ;;  %v329_v28 = vsub.f32 %v4026_v24, %v5476_v3  ;;  %5634 = vst [vmem:[#allocation15_spill] sm:$0xff] %v4076_v43  ;;  %v5635_v11 = vand.u32 4294901760, %v4036_v37  ;;  %5636 = vst [vmem:[#allocation16_spill] sm:$0xff] %v4085_v58 }
  0x21   :  { %v3243_v4 = vpack.c.bf16 %v306_v10, %v294_v27  ;;  %v318_v7 = vand.u32 4294901760, %v317_v23  ;;  %v5481_v3 = vand.u32 4294901760, %v4057_v35  ;;  %v4091_v10 = vsub.f32 %v4041_v12, %v5637_v32  ;;  %v4096_v23 = vld [vmem:[%s5424_s1 + $0xf8] sm:$0xff]  ;;  %v4106_v32 = vld [vmem:[%s5424_s1 + $0xe0] sm:$0xff] }
  0x22   :  { %v323_v25 = vsub.f32 %v4036_v37, %v5635_v11  ;;  %v3245_v34 = vpack.c.bf16 %v312_v22, %v300_v18  ;;  %v330_v53 = vand.u32 4294901760, %v329_v28  ;;  %5638 = vst [vmem:[#allocation17_spill] sm:$0xff] %v4096_v23  ;;  %v5484_v18 = vand.u32 4294901760, %v4071_v5  ;;  %5639 = vst [vmem:[#allocation18_spill] sm:$0xff] %v4106_v32 }
  0x23   :  { %3244 = vmatprep.subr.bf16.mxu0 %v3243_v4  ;;  %v335_v11 = vsub.f32 %v4057_v35, %v5481_v3  ;;  %v5488_v54 = vand.u32 4294901760, %v4091_v10  ;;  %v5640_v4 = vand.u32 4294901760, %v4062_v55  ;;  %v5490_v3 = vand.u32 4294901760, %v4085_v58 }
  0x24   :  { %v324_v27 = vand.u32 4294901760, %v323_v25  ;;  %3246 = vmatpush1.bf16.msra.mxu0 %v3245_v34  ;;  %v3247_v28 = vpack.c.bf16 %v330_v53, %v318_v7  ;;  %v4118_v22 = vsub.f32 %v4071_v5, %v5484_v18  ;;  %v5641_v59 = vand.u32 4294901760, %v4076_v43  ;;  %v4129_v53 = vld [vmem:[%s5424_s1 + $0xf0] sm:$0xff] }
  0x25   :  { %v4112_v25 = vsub.f32 %v4062_v55, %v5640_v4  ;;  %v336_v12 = vand.u32 4294901760, %v335_v11  ;;  %5642 = vst [vmem:[#allocation19_spill] sm:$0xff] %v4129_v53  ;;  %v341_v11 = vsub.f32 %v4091_v10, %v5488_v54  ;;  %v4138_v18 = vsub.f32 %v4085_v58, %v5490_v3 }
  0x26   :  { %v4123_v34 = vsub.f32 %v4076_v43, %v5641_v59  ;;  %3248 = vmatprep.subr.bf16.mxu0 %v3247_v28  ;;  %v5498_v59 = vand.u32 4294901760, %v4106_v32  ;;  %v5493_v43 = vand.u32 4294901760, %v4118_v22  ;;  %v5643_v28 = vand.u32 4294901760, %v4096_v23 }
  0x27   :  { %v5492_v4 = vand.u32 4294901760, %v4112_v25  ;;  %v3249_v7 = vpack.c.bf16 %v336_v12, %v324_v27  ;;  %v342_v54 = vand.u32 4294901760, %v341_v11  ;;  %v5502_v3 = vand.u32 4294901760, %v4138_v18 }
  0x28   :  { %v5496_v5 = vand.u32 4294901760, %v4123_v34  ;;  %v4146_v55 = vsub.f32 %v4096_v23, %v5643_v28  ;;  %v5503_v58 = vand.u32 4294901760, %v4129_v53  ;;  %v347_v12 = vsub.f32 %v4118_v22, %v5493_v43 }
  0x29   :  { %v353_v60 = vsub.f32 %v4112_v25, %v5492_v4  ;;  %3250 = vmatpush1.bf16.msra.mxu0 %v3249_v7  ;;  %v4163_v11 = vsub.f32 %v4106_v32, %v5498_v59  ;;  %v365_v7 = vsub.f32 %v4138_v18, %v5502_v3 }
  0x2a   :  { %v359_v27 = vsub.f32 %v4123_v34, %v5496_v5  ;;  %v5506_v28 = vand.u32 4294901760, %v4146_v55  ;;  %v4171_v43 = vsub.f32 %v4129_v53, %v5503_v58  ;;  %v348_v23 = vand.u32 4294901760, %v347_v12 }
  0x2b   :  { %v354_v4 = vand.u32 4294901760, %v353_v60  ;;  %v5505_v61 = vand.u32 4294901760, %v4163_v11  ;;  %v366_v32 = vand.u32 4294901760, %v365_v7  ;;  %v5648_v7 = vand.u32 4294901760, %v3715_v2 }
  0x2c   :  { %v360_v49 = vand.u32 4294901760, %v359_v27  ;;  %v377_v5 = vsub.f32 %v4146_v55, %v5506_v28  ;;  %v382_v60 = vand.u32 4294901760, %v4171_v43  ;;  %v5653_v2 = vand.u32 4294901760, %v3743_v13 }
  0x2d   :  { %v3251_v59 = vpack.c.bf16 %v354_v4, %v342_v54  ;;  %v371_v3 = vsub.f32 %v4163_v11, %v5505_v61  ;;  %v17_v54 = vld [vmem:[%s5425_s0] sm:$0xff]  ;;  %v3261_v4 = vpack.c.bf16 %v3769_v19, %v3763_v17  ;;  %v5660_v13 = vand.u32 4294901760, %v3779_v21 }
  0x2e   :  { %v3253_v33 = vpack.c.bf16 %v360_v49, %v348_v23  ;;  %v378_v57 = vand.u32 4294901760, %v377_v5  ;;  %v383_v12 = vsub.f32 %v4171_v43, %v382_v60  ;;  %v3259_v49 = vpack.c.bf16 %v3758_v16, %v3753_v15 }
  0x2f   :  { %3252 = vmatprep.subr.bf16.mxu0 %v3251_v59  ;;  %v372_v58 = vand.u32 4294901760, %v371_v3  ;;  %v4187_v23 = vand.u32 4294901760, %v17_v54  ;;  %v4194_v3 = vld [vmem:[%s5425_s0 + $0x8] sm:$0xff]  ;;  %v3267_v59 = vpack.c.bf16 %v3870_v63, %v3865_v62 }
  0x30   :  { %3254 = vmatpush1.bf16.msra.mxu0 %v3253_v33  ;;  %v3255_v27 = vpack.c.bf16 %v378_v57, %v366_v32  ;;  %v384_v53 = vand.u32 4294901760, %v383_v12  ;;  %v5645_v57 = vand.u32 4294901760, %v3705_v0  ;;  %v5646_v33 = vand.u32 4294901760, %v3710_v1 }
  0x31   :  { %5644 = vst [vmem:[#allocation20_spill] sm:$0xff] %v4187_v23  ;;  %v3269_v0 = vpack.c.bf16 %v3891_v44, %v3882_v36  ;;  %v4213_v1 = vand.u32 4294901760, %v4194_v3  ;;  %v5649_v12 = vand.u32 4294901760, %v3724_v6  ;;  %v5654_v6 = vand.u32 4294901760, %v3748_v14 }
  0x32   :  { %3256 = vmatprep.subr.bf16.mxu0 %v3255_v27  ;;  %v3257_v5 = vpack.c.bf16 %v384_v53, %v372_v58  ;;  %v4200_v32 = vpack.c.bf16 %v5646_v33, %v5645_v57  ;;  %v3263_v58 = vpack.c.bf16 %v3779_v21, %v3774_v20  ;;  %v3265_v53 = vpack.c.bf16 %v3796_v30, %v3788_v26 }
  0x33   :  { %v4219_v27 = vpack.c.bf16 %v5649_v12, %v5648_v7  ;;  %v5651_v57 = vand.u32 4294901760, %v3730_v8  ;;  %v5652_v33 = vand.u32 4294901760, %v3735_v9  ;;  %v4237_v7 = vpack.c.bf16 %v5654_v6, %v5653_v2 }
  0x34   :  { %3258 = vmatpush1.bf16.msra.mxu0 %v3257_v5  ;;  %5647 = vst [vmem:[#allocation21_spill] sm:$0xff] %v4200_v32  ;;  %3196 = vmatprep.subr.bf16.mxu1 %v4200_v32  ;;  %v4225_v5 = vld [vmem:[%s5425_s0 + $0x10] sm:$0xff]  ;;  %v5656_v12 = vand.u32 4294901760, %v3758_v16  ;;  %v5657_v32 = vand.u32 4294901760, %v3763_v17  ;;  %v5658_v8 = vand.u32 4294901760, %v3769_v19  ;;  %v5664_v17 = vand.u32 4294901760, %v3870_v63 }
  0x35   :  { %3260 = vmatprep.subr.bf16.mxu0 %v3259_v49  ;;  %v5650_v49 = vmov 0.0   ;;  %v4231_v61 = vpack.c.bf16 %v5652_v33, %v5651_v57  ;;  %v5659_v57 = vand.u32 4294901760, %v3774_v20  ;;  %v5661_v33 = vand.u32 4294901760, %v3788_v26  ;;  %3198 = vmatpush1.bf16.msra.mxu1 %v4219_v27 }
  0x36   :  { %v4249_v9 = vpack.c.bf16 %v5658_v8, %v5657_v32  ;;  %v5665_v19 = vand.u32 4294901760, %v3882_v36  ;;  %v5666_v20 = vand.u32 4294901760, %v3891_v44  ;;  %v5667_v21 = vand.u32 4294901760, %v3896_v46 }
  0x37   :  { %420 = vmatmul.mubr.f32.vlgmr.msra.gmra.mrb[0].mxu0 %v4187_v23  ;;  %v4255_v14 = vpack.c.bf16 %v5660_v13, %v5659_v57  ;;  %v5668_v26 = vand.u32 4294901760, %v3902_v48  ;;  %v5671_v63 = vand.u32 4294901760, %v3979_v47  ;;  %v5672_v36 = vand.u32 4294901760, %v3991_v38  ;;  %3200 = vmatprep.subr.bf16.mxu1 %v4231_v61 }
  0x38   :  { %3262 = vmatpush1.bf16.msra.mxu0 %v3261_v4  ;;  %425 = vmatprep.mubr.f32.mxu0 %v5650_v49  ;;  %v5655_v4 = vand.u32 4294901760, %v3753_v15  ;;  %v5662_v15 = vand.u32 4294901760, %v3796_v30  ;;  %v4273_v32 = vpack.c.bf16 %v5666_v20, %v5665_v19  ;;  %v5669_v30 = vand.u32 4294901760, %v3908_v52 }
  0x39   :  { %3264 = vmatprep.subr.bf16.mxu0 %v3263_v58  ;;  %v5663_v58 = vand.u32 4294901760, %v3865_v62  ;;  %v4279_v6 = vpack.c.bf16 %v5668_v26, %v5667_v21  ;;  %v5670_v62 = vand.u32 4294901760, %v3926_v31  ;;  %v4296_v44 = vand.u32 4294901760, %v4225_v5  ;;  %v4321_v21 = vld [vmem:[%s5425_s0 + $0x18] sm:$0xff]  ;;  %3202 = vmatpush1.bf16.msra.mxu1 %v4237_v7 }
  0x3a   :  { %v4243_v28 = vpack.c.bf16 %v5656_v12, %v5655_v4  ;;  %v4261_v16 = vpack.c.bf16 %v5662_v15, %v5661_v33  ;;  %v4291_v12 = vpack.c.bf16 %v5672_v36, %v5671_v63  ;;  %v5673_v8 = vand.u32 4294901760, %v3998_v41 }
  0x3b   :  { %v4267_v2 = vpack.c.bf16 %v5664_v17, %v5663_v58  ;;  %v4285_v4 = vpack.c.bf16 %v5670_v62, %v5669_v30  ;;  %427 = vmatmul.mubr.f32.gmra.mrb[2].mxu0 %v4213_v1  ;;  %v5674_v57 = vand.u32 4294901760, %v4003_v29  ;;  %v5675_v33 = vand.u32 4294901760, %v4015_v42 }
  0x3c   :  { %v5676_v15 = vand.u32 4294901760, %v4026_v24  ;;  %v5677_v17 = vand.u32 4294901760, %v4036_v37  ;;  %v5678_v19 = vand.u32 4294901760, %v4057_v35  ;;  %3266 = vmatpush1.bf16.msra.mxu0 %v3265_v53  ;;  %432 = vmatprep.mubr.f32.mxu0 %v5650_v49  ;;  %v5680_v26 = vand.u32 4294901760, %v4091_v10 }
  0x3d   :  { %v4302_v13 = vpack.c.bf16 %v5674_v57, %v5673_v8  ;;  %v5681_v30 = vand.u32 4294901760, %v4112_v25  ;;  %v5683_v63 = vand.u32 4294901760, %v4118_v22  ;;  %v5684_v36 = vand.u32 4294901760, %v4123_v34  ;;  %3268 = vmatprep.subr.bf16.mxu0 %v3267_v59 }
  0x3e   :  { %v4308_v58 = vpack.c.bf16 %v5676_v15, %v5675_v33  ;;  %v4314_v20 = vpack.c.bf16 %v5678_v19, %v5677_v17  ;;  %v5686_v53 = vand.u32 4294901760, %v4138_v18  ;;  %v5687_v57 = vand.u32 4294901760, %v4146_v55 }
  0x3f   :  { %v4327_v62 = vpack.c.bf16 %v5681_v30, %v5680_v26  ;;  %v4333_v8 = vpack.c.bf16 %v5684_v36, %v5683_v63  ;;  %v3271_v15 = vpack.c.bf16 %v3902_v48, %v3896_v46  ;;  %v5689_v17 = vand.u32 4294901760, %v3821_v39  ;;  %434 = vmatmul.mubr.f32.gmra.mrb[4].mxu0 %v4296_v44 }
  0x40   :  { %5679 = vst [vmem:[#allocation22_spill] sm:$0xff] %v4314_v20  ;;  %v4339_v33 = vpack.c.bf16 %v5687_v57, %v5686_v53  ;;  %v5690_v19 = vand.u32 4294901760, %v3826_v40  ;;  %v5691_v30 = vand.u32 4294901760, %v4163_v11  ;;  %v4356_v36 = vand.u32 4294901760, %v4321_v21  ;;  %3270 = vmatpush1.bf16.msra.mxu0 %v3269_v0  ;;  %439 = vmatprep.mubr.f32.mxu0 %v5650_v49 }
  0x41   :  { %5682 = vst [vmem:[#allocation23_spill] sm:$0xff] %v4327_v62  ;;  %5685 = vst [vmem:[#allocation24_spill] sm:$0xff] %v4333_v8  ;;  %v3273_v39 = vpack.c.bf16 %v3926_v31, %v3908_v52  ;;  %v5693_v40 = vand.u32 4294901760, %v3834_v45  ;;  %v5694_v46 = vand.u32 4294901760, %v3842_v50  ;;  %3272 = vmatprep.subr.bf16.mxu0 %v3271_v15  ;;  %v5695_v59 = vand.u32 4294901760, %v3847_v51  ;;  %v5731_v8 = vld [vmem:[#allocation13_spill] sm:$0xff] }
  0x42   :  { %5688 = vst [vmem:[#allocation25_spill] sm:$0xff] %v4339_v33  ;;  %v4347_v26 = vpack.c.bf16 %v5690_v19, %v5689_v17  ;;  %v4351_v63 = vpack.c.bf16 %v382_v60, %v5691_v30  ;;  %v3275_v60 = vpack.c.bf16 %v3991_v38, %v3979_v47  ;;  %v5696_v53 = vand.u32 4294901760, %v3854_v56  ;;  %v5697_v56 = vld [vmem:[#allocation2_spill] sm:$0xff]  ;;  %v5699_v47 = vld [vmem:[#allocation3_spill] sm:$0xff] }
  0x43   :  { %v4366_v48 = vpack.c.bf16 %v5694_v46, %v5693_v40  ;;  %v4378_v31 = vsub.f32 %v17_v54, %v4187_v23  ;;  %v3277_v45 = vpack.c.bf16 %v4003_v29, %v3998_v41  ;;  %441 = vmatmul.mubr.f32.gmra.mrb[6].mxu0 %v4356_v36  ;;  %v3279_v50 = vpack.c.bf16 %v4026_v24, %v4015_v42  ;;  %v4398_v41 = vld [vmem:[%s5426_s2 + $0x80] sm:$0xff]  ;;  %v4403_v42 = vld [vmem:[%s5426_s2 + $0x88] sm:$0xff]  ;;  %v5701_v29 = vld [vmem:[#allocation4_spill] sm:$0xff] }
  0x44   :  { %5692 = vst [vmem:[#allocation26_spill] sm:$0xff] %v4351_v63  ;;  %3204 = vmatprep.subr.bf16.mxu1 %v4347_v26  ;;  %v4374_v0 = vpack.c.bf16 %v5696_v53, %v5695_v59  ;;  %3274 = vmatpush1.bf16.msra.mxu0 %v3273_v39  ;;  %v3281_v51 = vpack.c.bf16 %v4057_v35, %v4036_v37  ;;  %v5698_v52 = vand.u32 4294901760, %v5697_v56  ;;  %v5700_v38 = vand.u32 4294901760, %v5699_v47  ;;  %v4408_v37 = vld [vmem:[%s5426_s2] sm:$0xff]  ;;  %v5703_v35 = vld [vmem:[#allocation5_spill] sm:$0xff]  ;;  %v4421_v30 = vld [vmem:[%s5426_s2 + $0x8] sm:$0xff] }
  0x45   :  { %3206 = vmatpush1.bf16.msra.mxu1 %v4366_v48  ;;  %575 = vmatprep.mubr.f32.mxu0 %v5650_v49  ;;  %v5702_v24 = vand.u32 4294901760, %v5701_v29  ;;  %v5704_v57 = vand.u32 4294901760, %v5703_v35  ;;  %v5511_v17 = vand.u32 4294901760, %v4398_v41  ;;  %v5510_v19 = vand.u32 4294901760, %v4403_v42  ;;  %v4427_v40 = vld [vmem:[%s5426_s2 + $0x90] sm:$0xff]  ;;  %v4432_v46 = vld [vmem:[%s5426_s2 + $0x98] sm:$0xff] }
  0x46   :  { %3208 = vmatprep.subr.bf16.mxu1 %v4374_v0  ;;  %v4393_v54 = vpack.c.bf16 %v5700_v38, %v5698_v52  ;;  %3276 = vmatprep.subr.bf16.mxu0 %v3275_v60  ;;  %v5509_v39 = vand.u32 4294901760, %v4408_v37  ;;  %v3283_v60 = vpack.c.bf16 %v4112_v25, %v4091_v10  ;;  %v3285_v59 = vpack.c.bf16 %v4123_v34, %v4118_v22  ;;  %v4444_v52 = vld [vmem:[%s5426_s2 + $0x10] sm:$0xff]  ;;  %v4449_v47 = vld [vmem:[%s5426_s2 + $0x18] sm:$0xff]  ;;  %v4454_v10 = vld [vmem:[%s5426_s2 + $0xa0] sm:$0xff] }
  0x47   :  { %v4414_v15 = vpack.c.bf16 %v5704_v57, %v5702_v24  ;;  %v4460_v22 = vsub.f32 %v4398_v41, %v5511_v17  ;;  %v4465_v25 = vsub.f32 %v4403_v42, %v5510_v19  ;;  %v4476_v29 = vld [vmem:[%s5426_s2 + $0xa8] sm:$0xff]  ;;  %v4481_v24 = vld [vmem:[%s5426_s2 + $0x20] sm:$0xff]  ;;  %v5712_v56 = vld [vmem:[#allocation8_spill] sm:$0xff]  ;;  %v5716_v23 = vand.u32 4294901760, %v4421_v30 }
  0x48   :  { %v4470_v34 = vsub.f32 %v4408_v37, %v5509_v39  ;;  %v4486_v35 = vld [vmem:[%s5426_s2 + $0x28] sm:$0xff]  ;;  %3278 = vmatpush1.bf16.msra.mxu0 %v3277_v45  ;;  %v5708_v57 = vld [vmem:[#allocation6_spill] sm:$0xff]  ;;  %v5713_v53 = vand.u32 4294901760, %v5712_v56  ;;  %v5718_v33 = vand.u32 4294901760, %v4427_v40  ;;  %v5524_v56 = vand.u32 4294901760, %v4454_v10 }
  0x49   :  { %3210 = vmatpush1.bf16.msra.mxu1 %v4393_v54  ;;  %5705 = vst [vmem:[#allocation2_spill] sm:$0xff] %v4460_v22  ;;  %5706 = vst [vmem:[#allocation3_spill] sm:$0xff] %v4465_v25  ;;  %v5709_v39 = vand.u32 4294901760, %v5708_v57  ;;  %v5710_v19 = vld [vmem:[#allocation7_spill] sm:$0xff]  ;;  %v4503_v63 = vsub.f32 %v4421_v30, %v5716_v23  ;;  %3280 = vmatprep.subr.bf16.mxu0 %v3279_v50  ;;  %v5522_v23 = vand.u32 4294901760, %v4449_v47  ;;  %v4532_v57 = vld [vmem:[%s5426_s2 + $0xb8] sm:$0xff] }
  0x4a   :  { %3212 = vmatprep.subr.bf16.mxu1 %v4414_v15  ;;  %5707 = vst [vmem:[#allocation4_spill] sm:$0xff] %v4470_v34  ;;  %v5711_v17 = vand.u32 4294901760, %v5710_v19  ;;  %v5714_v34 = vld [vmem:[#allocation9_spill] sm:$0xff]  ;;  %v4508_v45 = vsub.f32 %v4427_v40, %v5718_v33  ;;  %v5720_v19 = vand.u32 4294901760, %v4432_v46  ;;  %v3287_v33 = vpack.c.bf16 %v4146_v55, %v4138_v18 }
  0x4b   :  { %v5715_v25 = vand.u32 4294901760, %v5714_v34  ;;  %5717 = vst [vmem:[#allocation5_spill] sm:$0xff] %v4503_v63  ;;  %v4548_v18 = vsub.f32 %v4449_v47, %v5522_v23  ;;  %v4553_v34 = vsub.f32 %v4454_v10, %v5524_v56  ;;  %v5729_v23 = vld [vmem:[#allocation12_spill] sm:$0xff]  ;;  %v5732_v62 = vand.u32 4294901760, %v5731_v8 }
  0x4c   :  { %v4492_v38 = vpack.c.bf16 %v5711_v17, %v5709_v39  ;;  %5719 = vst [vmem:[#allocation6_spill] sm:$0xff] %v4508_v45  ;;  %v4513_v17 = vld [vmem:[%s5426_s2 + $0xb0] sm:$0xff]  ;;  %v4518_v39 = vsub.f32 %v4432_v46, %v5720_v19  ;;  %3282 = vmatpush1.bf16.msra.mxu0 %v3281_v51  ;;  %v5733_v50 = vand.u32 4294901760, %v4476_v29  ;;  %v5735_v20 = vand.u32 4294901760, %v4481_v24 }
  0x4d   :  { %v4498_v22 = vpack.c.bf16 %v5715_v25, %v5713_v53  ;;  %v5517_v53 = vand.u32 4294901760, %v4444_v52  ;;  %v4537_v19 = vld [vmem:[%s5426_s2 + $0x30] sm:$0xff]  ;;  %5723 = vst [vmem:[#allocation9_spill] sm:$0xff] %v4548_v18  ;;  %5724 = vst [vmem:[#allocation27_spill] sm:$0xff] %v4553_v34  ;;  %v4559_v25 = vld [vmem:[%s5426_s2 + $0x38] sm:$0xff]  ;;  %v5730_v18 = vand.u32 4294901760, %v5729_v23  ;;  %3284 = vmatprep.subr.bf16.mxu0 %v3283_v60 }
  0x4e   :  { %5721 = vst [vmem:[#allocation7_spill] sm:$0xff] %v4518_v39  ;;  %3214 = vmatpush1.bf16.msra.mxu1 %v4492_v38  ;;  %v5727_v39 = vld [vmem:[#allocation11_spill] sm:$0xff]  ;;  %v4576_v34 = vsub.f32 %v4476_v29, %v5733_v50  ;;  %v4581_v51 = vsub.f32 %v4481_v24, %v5735_v20  ;;  %v1165_v8 = vand.u32 4294901760, %v4532_v57  ;;  %v5529_v23 = vand.u32 4294901760, %v4537_v19 }
  0x4f   :  { %3216 = vmatprep.subr.bf16.mxu1 %v4498_v22  ;;  %v4543_v55 = vsub.f32 %v4444_v52, %v5517_v53  ;;  %v5725_v53 = vld [vmem:[#allocation10_spill] sm:$0xff]  ;;  %v5728_v45 = vand.u32 4294901760, %v5727_v39  ;;  %v4571_v56 = vpack.c.bf16 %v5732_v62, %v5730_v18  ;;  %v5739_v62 = vand.u32 4294901760, %v4513_v17 }
  0x50   :  { %5734 = vst [vmem:[#allocation10_spill] sm:$0xff] %v4576_v34  ;;  %5736 = vst [vmem:[#allocation11_spill] sm:$0xff] %v4581_v51  ;;  %v1117_v20 = vand.u32 4294901760, %v4559_v25  ;;  %v4600_v50 = vsub.f32 %v4532_v57, %v1165_v8  ;;  %3286 = vmatpush1.bf16.msra.mxu0 %v3285_v59  ;;  %v3289_v18 = vpack.c.bf16 %v4171_v43, %v4163_v11  ;;  %v5749_v59 = vld [vmem:[#allocation17_spill] sm:$0xff]  ;;  %v5751_v43 = vand.u32 4294901760, %v4378_v31 }
  0x51   :  { %5722 = vst [vmem:[#allocation8_spill] sm:$0xff] %v4543_v55  ;;  %v5726_v55 = vand.u32 4294901760, %v5725_v53  ;;  %v4592_v53 = vsub.f32 %v4513_v17, %v5739_v62  ;;  %3288 = vmatprep.subr.bf16.mxu0 %v3287_v33  ;;  %v4620_v57 = vsub.f32 %v4194_v3, %v4213_v1  ;;  %v5752_v33 = vand.u32 4294901760, %v4398_v41 }
  0x52   :  { %5741 = vst [vmem:[#allocation28_spill] sm:$0xff] %v4600_v50  ;;  %v4616_v60 = vsub.f32 %v4559_v25, %v1117_v20  ;;  %v5750_v50 = vand.u32 4294901760, %v5749_v59  ;;  %v153_v11 = vsub.f32 %v4378_v31, %v5751_v43  ;;  %v5753_v3 = vand.u32 4294901760, %v4403_v42 }
  0x53   :  { %v4565_v63 = vpack.c.bf16 %v5728_v45, %v5726_v55  ;;  %v5737_v45 = vand.u32 4294901760, %v4486_v35  ;;  %5740 = vst [vmem:[#allocation13_spill] sm:$0xff] %v4592_v53  ;;  %v4605_v55 = vsub.f32 %v4537_v19, %v5529_v23  ;;  %v5745_v53 = vld [vmem:[#allocation15_spill] sm:$0xff]  ;;  %v5747_v23 = vld [vmem:[#allocation16_spill] sm:$0xff]  ;;  %v163_v25 = vand.u32 4294901760, %v4620_v57 }
  0x54   :  { %3290 = vmatpush1.bf16.msra.mxu0 %v3289_v18  ;;  %v4649_v59 = vsub.f32 %v4225_v5, %v4296_v44  ;;  %v154_v43 = vand.u32 4294901760, %v153_v11  ;;  %v5760_v42 = vand.u32 4294901760, %v4408_v37  ;;  %v5761_v18 = vand.u32 4294901760, %v4421_v30 }
  0x55   :  { %v4586_v39 = vsub.f32 %v4486_v35, %v5737_v45  ;;  %3218 = vmatpush1.bf16.msra.mxu1 %v4565_v63  ;;  %5742 = vst [vmem:[#allocation29_spill] sm:$0xff] %v4605_v55  ;;  %v5743_v45 = vld [vmem:[#allocation14_spill] sm:$0xff]  ;;  %v5748_v55 = vand.u32 4294901760, %v5747_v23  ;;  %v164_v41 = vsub.f32 %v4620_v57, %v163_v25  ;;  %v5763_v5 = vand.u32 4294901760, %v4427_v40 }
  0x56   :  { %3220 = vmatprep.subr.bf16.mxu1 %v4571_v56  ;;  %v5744_v62 = vand.u32 4294901760, %v5743_v45  ;;  %v5764_v11 = vand.u32 4294901760, %v4432_v46  ;;  %v184_v37 = vsub.f32 %v4321_v21, %v4356_v36  ;;  %v5766_v40 = vand.u32 4294901760, %v4444_v52 }
  0x57   :  { %5738 = vst [vmem:[#allocation12_spill] sm:$0xff] %v4586_v39  ;;  %v5746_v39 = vand.u32 4294901760, %v5745_v53  ;;  %v4626_v34 = vpack.c.bf16 %v5750_v50, %v5748_v55  ;;  %v5755_v53 = vld [vmem:[#allocation18_spill] sm:$0xff]  ;;  %v5757_v50 = vld [vmem:[#allocation19_spill] sm:$0xff]  ;;  %578 = vmatmul.mubr.f32.vlgmr.msra.gmra.mrb[0].mxu0 %v4378_v31  ;;  %v165_v30 = vand.u32 4294901760, %v164_v41  ;;  %v5767_v46 = vand.u32 4294901760, %v4449_v47 }
  0x58   :  { %v5756_v23 = vand.u32 4294901760, %v5755_v53  ;;  %v5758_v55 = vand.u32 4294901760, %v5757_v50  ;;  %v4668_v53 = vpack.c.bf16 %v5764_v11, %v5763_v5  ;;  %583 = vmatprep.mubr.f32.mxu0 %v5650_v49  ;;  %v5769_v21 = vand.u32 4294901760, %v4454_v10 }
  0x59   :  { %v4613_v51 = vpack.c.bf16 %v5746_v39, %v5744_v62  ;;  %v4638_v39 = vpack.c.bf16 %v5753_v3, %v5752_v33  ;;  %v5759_v62 = vld [vmem:[#allocation21_spill] sm:$0xff]  ;;  %v4659_v33 = vpack.c.bf16 %v5761_v18, %v5760_v42  ;;  %v174_v3 = vand.u32 4294901760, %v4649_v59 }
  0x5a   :  { %v4644_v45 = vpack.c.bf16 %v5758_v55, %v5756_v23  ;;  %3292 = vmatprep.subr.bf16.mxu0 %v5759_v62  ;;  %5765 = vst [vmem:[#allocation16_spill] sm:$0xff] %v4668_v53  ;;  %v4682_v50 = vpack.c.bf16 %v5767_v46, %v5766_v40  ;;  %v185_v55 = vand.u32 4294901760, %v184_v37  ;;  %v5772_v42 = vand.u32 4294901760, %v4481_v24  ;;  %v5792_v40 = vld [vmem:[#allocation2_spill] sm:$0xff] }
  0x5b   :  { %3222 = vmatpush1.bf16.msra.mxu1 %v4613_v51  ;;  %5754 = vst [vmem:[#allocation14_spill] sm:$0xff] %v4638_v39  ;;  %5762 = vst [vmem:[#allocation15_spill] sm:$0xff] %v4659_v33  ;;  %3294 = vmatpush1.bf16.msra.mxu0 %v4219_v27  ;;  %v175_v23 = vsub.f32 %v4649_v59, %v174_v3  ;;  %v5773_v10 = vand.u32 4294901760, %v4486_v35  ;;  %v5775_v18 = vand.u32 4294901760, %v4513_v17  ;;  %v5777_v35 = vand.u32 4294901760, %v4537_v19 }
  0x5c   :  { %3224 = vmatprep.subr.bf16.mxu1 %v4626_v34  ;;  %3296 = vmatprep.subr.bf16.mxu0 %v4231_v61  ;;  %5768 = vst [vmem:[#allocation17_spill] sm:$0xff] %v4682_v50  ;;  %v186_v47 = vsub.f32 %v184_v37, %v185_v55  ;;  %v5779_v17 = vand.u32 4294901760, %v4378_v31  ;;  %v5533_v46 = vand.u32 4294901760, %v5792_v40 }
  0x5d   :  { %586 = vmatmul.mubr.f32.gmra.mrb[2].mxu0 %v4620_v57  ;;  %v176_v52 = vand.u32 4294901760, %v175_v23  ;;  %v4707_v5 = vpack.c.bf16 %v1165_v8, %v5775_v18  ;;  %v1076_v8 = vld [vmem:[%s5426_s2 + $0x68] sm:$0xff]  ;;  %v1078_v23 = vld [vmem:[%s5426_s2 + $0x78] sm:$0xff] }
  0x5e   :  { %591 = vmatprep.mubr.f32.mxu0 %v5650_v49  ;;  %v187_v24 = vand.u32 4294901760, %v186_v47  ;;  %v1135_v57 = vand.u32 4294901760, %v1076_v8  ;;  %v5794_v47 = vld [vmem:[#allocation4_spill] sm:$0xff] }
  0x5f   :  { %3226 = vmatpush1.bf16.msra.mxu1 %v4644_v45  ;;  %3298 = vmatpush1.bf16.msra.mxu0 %v4237_v7  ;;  %5776 = vst [vmem:[#allocation21_spill] sm:$0xff] %v4707_v5 }
  0x60   :  { %3388 = vmatprep.subr.bf16.mxu1 %v4638_v39  ;;  %3300 = vmatprep.subr.bf16.mxu0 %v4347_v26 }
  0x61   :  { %594 = vmatmul.mubr.f32.gmra.mrb[4].mxu0 %v4649_v59  ;;  %v4716_v59 = vpack.c.bf16 %v1117_v20, %v5777_v35  ;;  %v1368_v35 = vsub.f32 %v5792_v40, %v5533_v46 }
  0x62   :  { %155 = vmatmul.mubr.f32.vlgmr.msra.gmra.mrb[0].mxu1 %v154_v43  ;;  %v5770_v43 = vand.u32 4294901760, %v4476_v29  ;;  %v4701_v29 = vpack.c.bf16 %v5773_v10, %v5772_v42  ;;  %599 = vmatprep.mubr.f32.mxu0 %v5650_v49  ;;  %v5539_v42 = vand.u32 4294901760, %v5794_v47  ;;  %v5795_v10 = vld [vmem:[#allocation5_spill] sm:$0xff] }
  0x63   :  { %160 = vmatprep.mubr.f32.mxu1 %v5650_v49  ;;  %3390 = vmatpush3.bf16.msra.mxu1 %v4659_v33  ;;  %5778 = vst [vmem:[#allocation30_spill] sm:$0xff] %v4716_v59  ;;  %v5550_v18 = vand.u32 4294901760, %v5795_v10 }
  0x64   :  { %3392 = vmatprep.subr.bf16.mxu1 %v4668_v53  ;;  %v4690_v41 = vpack.c.bf16 %v5770_v43, %v5769_v21  ;;  %5774 = vst [vmem:[#allocation19_spill] sm:$0xff] %v4701_v29  ;;  %3302 = vmatpush1.bf16.msra.mxu0 %v4366_v48 }
  0x65   :  { %3304 = vmatprep.subr.bf16.mxu0 %v4374_v0  ;;  %602 = vmatmul.mubr.f32.gmra.mrb[6].mxu0 %v184_v37 }
  0x66   :  { %5771 = vst [vmem:[#allocation18_spill] sm:$0xff] %v4690_v41  ;;  %166 = vmatmul.mubr.f32.gmra.mrb[2].mxu1 %v165_v30  ;;  %704 = vmatprep.mubr.f32.mxu0 %v5650_v49  ;;  %v1077_v30 = vld [vmem:[%s5426_s2 + $0x70] sm:$0xff] }
  0x67   :  { %171 = vmatprep.mubr.f32.mxu1 %v5650_v49  ;;  %3394 = vmatpush3.bf16.msra.mxu1 %v4682_v50  ;;  %v1138_v43 = vand.u32 4294901760, %v1077_v30 }
  0x68   :  { %3396 = vmatprep.subr.bf16.mxu1 %v4690_v41  ;;  %3306 = vmatpush1.bf16.msra.mxu0 %v4393_v54 }
  0x69   :  { %3308 = vmatprep.subr.bf16.mxu0 %v4414_v15 }
  0x6a   :  { %177 = vmatmul.mubr.f32.gmra.mrb[4].mxu1 %v176_v52  ;;  %v1141_v52 = vand.u32 4294901760, %v1078_v23 }
  0x6b   :  { %182 = vmatprep.mubr.f32.mxu1 %v5650_v49  ;;  %3398 = vmatpush3.bf16.msra.mxu1 %v4701_v29 }
  0x6c   :  { %3400 = vmatprep.subr.bf16.mxu1 %v4707_v5  ;;  %3310 = vmatpush1.bf16.msra.mxu0 %v4492_v38 }
  0x6d   :  { %3312 = vmatprep.subr.bf16.mxu0 %v4498_v22 }
  0x6e   :  { %188 = vmatmul.mubr.f32.gmra.mrb[6].mxu1 %v187_v24 }
  0x6f   :  { %3402 = vmatpush3.bf16.msra.mxu1 %v4716_v59 }
  0x70   :  { %3314 = vmatpush1.bf16.msra.mxu0 %v4565_v63 }
  0x71   :  { %3316 = vmatprep.subr.bf16.mxu0 %v4571_v56 }
  0x74   :  { %3318 = vmatpush1.bf16.msra.mxu0 %v4613_v51 }
  0x75   :  { %3320 = vmatprep.subr.bf16.mxu0 %v4626_v34 }
  0x78   :  { %3322 = vmatpush1.bf16.msra.mxu0 %v4644_v45 }
  0x79   :  { %3324 = vmatprep.subr.bf16.mxu0 %v4243_v28  ;;  %v5780_v28 = vld [vmem:[#allocation22_spill] sm:$0xff] }
  0x7b   :  { %708 = vmatmul.mubr.f32.vlgmr.msra.gmra.mrb[0].mxu0 %v5779_v17 }
  0x7c   :  { %3326 = vmatpush1.bf16.msra.mxu0 %v4249_v9  ;;  %713 = vmatprep.mubr.f32.mxu0 %v5650_v49  ;;  %v5781_v9 = vld [vmem:[#allocation23_spill] sm:$0xff] }
  0x7d   :  { %3328 = vmatprep.subr.bf16.mxu0 %v4255_v14  ;;  %v5782_v14 = vld [vmem:[#allocation24_spill] sm:$0xff] }
  0x7f   :  { %717 = vmatmul.mubr.f32.gmra.mrb[2].mxu0 %v163_v25 }
  0x80   :  { %3330 = vmatpush1.bf16.msra.mxu0 %v4261_v16  ;;  %722 = vmatprep.mubr.f32.mxu0 %v5650_v49  ;;  %v5783_v16 = vld [vmem:[#allocation25_spill] sm:$0xff] }
  0x81   :  { %3332 = vmatprep.subr.bf16.mxu0 %v4267_v2  ;;  %v5784_v2 = vld [vmem:[#allocation26_spill] sm:$0xff] }
  0x83   :  { %726 = vmatmul.mubr.f32.gmra.mrb[4].mxu0 %v174_v3  ;;  %v1094_v3 = vld [vmem:[%s5426_s2 + $0xf8] sm:$0xff] }
  0x84   :  { %3334 = vmatpush1.bf16.msra.mxu0 %v4273_v32  ;;  %731 = vmatprep.mubr.f32.mxu0 %v5650_v49  ;;  %v5785_v32 = vld [vmem:[#allocation20_spill] sm:$0xff]  ;;  %v1189_v37 = vand.u32 4294901760, %v1094_v3 }
  0x85   :  { %3336 = vmatprep.subr.bf16.mxu0 %v4279_v6 }
  0x87   :  { %735 = vmatmul.mubr.f32.gmra.mrb[6].mxu0 %v185_v55  ;;  %v5793_v55 = vld [vmem:[#allocation3_spill] sm:$0xff] }
  0x88   :  { %3338 = vmatpush1.bf16.msra.mxu0 %v4285_v4  ;;  %901 = vmatprep.mubr.f32.mxu0 %v5650_v49  ;;  %v5536_v21 = vand.u32 4294901760, %v5793_v55 }
  0x89   :  { %3340 = vmatprep.subr.bf16.mxu0 %v4291_v12 }
  0x8a   :  { %v1375_v17 = vsub.f32 %v5793_v55, %v5536_v21 }
  0x8c   :  { %3342 = vmatpush1.bf16.msra.mxu0 %v4302_v13 }
  0x8d   :  { %3344 = vmatprep.subr.bf16.mxu0 %v4308_v58  ;;  %v1089_v58 = vld [vmem:[%s5426_s2 + $0xd0] sm:$0xff] }
  0x90   :  { %3346 = vmatpush1.bf16.msra.mxu0 %v5780_v28  ;;  %v4863_v28 = vpack.c.bf16 %v1141_v52, %v1138_v43 }
  0x91   :  { %3348 = vmatprep.subr.bf16.mxu0 %v5781_v9  ;;  %v1256_v9 = vsub.f32 %v5794_v47, %v5539_v42 }
  0x92   :  { %5797 = vst [vmem:[#allocation3_spill] sm:$0xff] %v4863_v28 }
  0x94   :  { %3350 = vmatpush1.bf16.msra.mxu0 %v5782_v14  ;;  %v1369_v14 = vand.u32 4294901760, %v1368_v35 }
  0x95   :  { %3352 = vmatprep.subr.bf16.mxu0 %v5783_v16  ;;  %v1376_v16 = vand.u32 4294901760, %v1375_v17 }
  0x98   :  { %3354 = vmatpush1.bf16.msra.mxu0 %v5784_v2  ;;  %v1263_v2 = vsub.f32 %v5795_v10, %v5550_v18 }
  0x99   :  { %3356 = vmatprep.subr.bf16.mxu0 %v5759_v62  ;;  %v1093_v62 = vld [vmem:[%s5426_s2 + $0xf0] sm:$0xff] }
  0x9a   :  { %v1186_v11 = vand.u32 4294901760, %v1093_v62 }
  0x9b   :  { %903 = vmatmul.mubr.f32.vlgmr.msra.gmra.mrb[0].mxu0 %v5785_v32 }
  0x9c   :  { %3358 = vmatpush1.bf16.msra.mxu0 %v4219_v27  ;;  %908 = vmatprep.mubr.f32.mxu0 %v5650_v49  ;;  %v1088_v27 = vld [vmem:[%s5426_s2 + $0xc8] sm:$0xff]  ;;  %v4855_v24 = vpack.c.bf16 %v1189_v37, %v1186_v11 }
  0x9d   :  { %3360 = vmatprep.subr.bf16.mxu0 %v4231_v61  ;;  %v1087_v61 = vld [vmem:[%s5426_s2 + $0xc0] sm:$0xff]  ;;  %v1171_v6 = vand.u32 4294901760, %v1088_v27 }
  0x9e   :  { %5796 = vst [vmem:[#allocation2_spill] sm:$0xff] %v4855_v24 }
  0x9f   :  { %910 = vmatmul.mubr.f32.gmra.mrb[2].mxu0 %v4213_v1  ;;  %v4874_v46 = vsub.f32 %v1088_v27, %v1171_v6  ;;  %v3419_v27 = vpack.c.bf16 %v1376_v16, %v1369_v14  ;;  %v4919_v16 = vsub.f32 %v1077_v30, %v1138_v43 }
  0xa0   :  { %3362 = vmatpush1.bf16.msra.mxu0 %v4237_v7  ;;  %915 = vmatprep.mubr.f32.mxu0 %v5650_v49  ;;  %v1168_v7 = vand.u32 4294901760, %v1087_v61 }
  0xa1   :  { %3364 = vmatprep.subr.bf16.mxu0 %v4347_v26  ;;  %v1090_v26 = vld [vmem:[%s5426_s2 + $0xd8] sm:$0xff] }
  0xa3   :  { %917 = vmatmul.mubr.f32.gmra.mrb[4].mxu0 %v4296_v44 }
  0xa4   :  { %3366 = vmatpush1.bf16.msra.mxu0 %v4366_v48  ;;  %922 = vmatprep.mubr.f32.mxu0 %v5650_v49  ;;  %v1073_v48 = vld [vmem:[%s5426_s2 + $0x50] sm:$0xff] }
  0xa5   :  { %3368 = vmatprep.subr.bf16.mxu0 %v4374_v0  ;;  %v1074_v0 = vld [vmem:[%s5426_s2 + $0x58] sm:$0xff]  ;;  %v1126_v31 = vand.u32 4294901760, %v1073_v48 }
  0xa7   :  { %924 = vmatmul.mubr.f32.gmra.mrb[6].mxu0 %v4356_v36  ;;  %v4885_v35 = vsub.f32 %v1073_v48, %v1126_v31  ;;  %v5804_v48 = vld [vmem:[#allocation9_spill] sm:$0xff] }
  0xa8   :  { %3370 = vmatpush1.bf16.msra.mxu0 %v4393_v54  ;;  %1026 = vmatprep.mubr.f32.mxu0 %v5650_v49  ;;  %v1129_v54 = vand.u32 4294901760, %v1074_v0 }
  0xa9   :  { %3372 = vmatprep.subr.bf16.mxu0 %v4414_v15  ;;  %5798 = vst [vmem:[#allocation4_spill] sm:$0xff] %v4885_v35 }
  0xaa   :  { %v4887_v17 = vsub.f32 %v1074_v0, %v1129_v54  ;;  %v5542_v0 = vand.u32 4294901760, %v5804_v48 }
  0xac   :  { %3374 = vmatpush1.bf16.msra.mxu0 %v4492_v38  ;;  %v1091_v38 = vld [vmem:[%s5426_s2 + $0xe0] sm:$0xff] }
  0xad   :  { %3376 = vmatprep.subr.bf16.mxu0 %v4498_v22  ;;  %v4817_v22 = vpack.c.bf16 %v1129_v54, %v1126_v31  ;;  %v5805_v31 = vld [vmem:[#allocation27_spill] sm:$0xff] }
  0xae   :  { %v5545_v54 = vand.u32 4294901760, %v5805_v31 }
  0xaf   :  { %5789 = vst [vmem:[#allocation25_spill] sm:$0xff] %v4817_v22 }
  0xb0   :  { %3378 = vmatpush1.bf16.msra.mxu0 %v4565_v63  ;;  %v1174_v63 = vand.u32 4294901760, %v1089_v58 }
  0xb1   :  { %3380 = vmatprep.subr.bf16.mxu0 %v4571_v56  ;;  %v1092_v56 = vld [vmem:[%s5426_s2 + $0xe8] sm:$0xff] }
  0xb2   :  { %v1183_v19 = vand.u32 4294901760, %v1092_v56 }
  0xb4   :  { %3382 = vmatpush1.bf16.msra.mxu0 %v4613_v51  ;;  %v1075_v51 = vld [vmem:[%s5426_s2 + $0x60] sm:$0xff] }
  0xb5   :  { %3384 = vmatprep.subr.bf16.mxu0 %v4626_v34  ;;  %v1180_v34 = vand.u32 4294901760, %v1091_v38  ;;  %v1132_v20 = vand.u32 4294901760, %v1075_v51 }
  0xb7   :  { %v4833_v25 = vpack.c.bf16 %v1183_v19, %v1180_v34 }
  0xb8   :  { %3386 = vmatpush1.bf16.msra.mxu0 %v4644_v45  ;;  %v4835_v45 = vpack.c.bf16 %v1135_v57, %v1132_v20 }
  0xb9   :  { %5790 = vst [vmem:[#allocation26_spill] sm:$0xff] %v4833_v25 }
  0xba   :  { %5791 = vst [vmem:[#allocation20_spill] sm:$0xff] %v4835_v45 }
  0xbb   :  { %1028 = vmatmul.mubr.f32.vlgmr.msra.gmra.mrb[0].mxu0 %v5785_v32  ;;  %v4872_v32 = vsub.f32 %v1087_v61, %v1168_v7  ;;  %v4891_v61 = vsub.f32 %v1092_v56, %v1183_v19 }
  0xbc   :  { %1033 = vmatprep.mubr.f32.mxu0 %v5650_v49 }
  0xbf   :  { %1035 = vmatmul.mubr.f32.gmra.mrb[2].mxu0 %v4213_v1  ;;  %v1071_v1 = vld [vmem:[%s5426_s2 + $0x40] sm:$0xff] }
  0xc0   :  { %1040 = vmatprep.mubr.f32.mxu0 %v5650_v49  ;;  %v1120_v4 = vand.u32 4294901760, %v1071_v1 }
  0xc3   :  { %1042 = vmatmul.mubr.f32.gmra.mrb[4].mxu0 %v4296_v44  ;;  %v4797_v44 = vpack.c.bf16 %v1171_v6, %v1168_v7  ;;  %v1257_v7 = vand.u32 4294901760, %v1256_v9  ;;  %v4893_v6 = vsub.f32 %v1075_v51, %v1132_v20  ;;  %v5807_v51 = vld [vmem:[#allocation11_spill] sm:$0xff]  ;;  %v4909_v20 = vsub.f32 %v1093_v62, %v1186_v11 }
  0xc4   :  { %1047 = vmatprep.mubr.f32.mxu0 %v5650_v49  ;;  %v1072_v49 = vld [vmem:[%s5426_s2 + $0x48] sm:$0xff]  ;;  %v1277_v62 = vsub.f32 %v5804_v48, %v5542_v0 }
  0xc5   :  { %v1123_v12 = vand.u32 4294901760, %v1072_v49  ;;  %5786 = vst [vmem:[#allocation22_spill] sm:$0xff] %v4797_v44  ;;  %3404 = vmatprep.subr.bf16.mxu1 %v4797_v44  ;;  %5800 = vst [vmem:[#allocation31_spill] sm:$0xff] %v4893_v6 }
  0xc7   :  { %1049 = vmatmul.mubr.f32.gmra.mrb[6].mxu0 %v4356_v36  ;;  %v4799_v13 = vpack.c.bf16 %v1123_v12, %v1120_v4  ;;  %v1177_v36 = vand.u32 4294901760, %v1090_v26  ;;  %v4878_v21 = vsub.f32 %v1072_v49, %v1123_v12  ;;  %v1264_v49 = vand.u32 4294901760, %v1263_v2 }
  0xc8   :  { %v4921_v2 = vsub.f32 %v1078_v23, %v1141_v52  ;;  %v5811_v23 = vld [vmem:[#allocation12_spill] sm:$0xff]  ;;  %v5812_v52 = vld [vmem:[#allocation13_spill] sm:$0xff] }
  0xc9   :  { %5787 = vst [vmem:[#allocation23_spill] sm:$0xff] %v4799_v13  ;;  %3406 = vmatpush3.bf16.msra.mxu1 %v4799_v13  ;;  %v4815_v15 = vpack.c.bf16 %v1177_v36, %v1174_v63  ;;  %v4883_v42 = vsub.f32 %v1090_v26, %v1177_v36  ;;  %v5549_v43 = vand.u32 4294901760, %v5811_v23 }
  0xcb   :  { %5788 = vst [vmem:[#allocation24_spill] sm:$0xff] %v4815_v15  ;;  %3408 = vmatprep.subr.bf16.mxu1 %v4815_v15 }
  0xcd   :  { %3410 = vmatpush3.bf16.msra.mxu1 %v4817_v22 }
  0xce   :  { %3412 = vmatprep.subr.bf16.mxu1 %v4833_v25  ;;  %v4881_v25 = vsub.f32 %v1089_v58, %v1174_v63  ;;  %v5802_v58 = vld [vmem:[#allocation7_spill] sm:$0xff]  ;;  %v5803_v63 = vld [vmem:[#allocation8_spill] sm:$0xff] }
  0xcf   :  { %v5544_v26 = vand.u32 4294901760, %v5802_v58  ;;  %v5543_v36 = vand.u32 4294901760, %v5803_v63  ;;  %5809 = vst [vmem:[#allocation7_spill] sm:$0xff] %v4919_v16  ;;  %5810 = vst [vmem:[#allocation8_spill] sm:$0xff] %v4921_v2 }
  0xd0   :  { %v5566_v15 = vand.u32 4294901760, %v4881_v25 }
  0xd1   :  { %3414 = vmatpush3.bf16.msra.mxu1 %v4835_v45  ;;  %v4876_v45 = vsub.f32 %v1071_v1, %v1120_v4  ;;  %v4895_v1 = vsub.f32 %v1076_v8, %v1135_v57  ;;  %v5801_v4 = vld [vmem:[#allocation6_spill] sm:$0xff]  ;;  %v5547_v8 = vand.u32 4294901760, %v5807_v51  ;;  %v4911_v57 = vsub.f32 %v1094_v3, %v1189_v37 }
  0xd2   :  { %3416 = vmatprep.subr.bf16.mxu1 %v4855_v24  ;;  %v4889_v24 = vsub.f32 %v1091_v38, %v1180_v34  ;;  %v5546_v12 = vand.u32 4294901760, %v5801_v4  ;;  %v4902_v38 = vpack.c.bf16 %v1264_v49, %v1257_v7  ;;  %v5806_v34 = vld [vmem:[#allocation10_spill] sm:$0xff]  ;;  %5808 = vst [vmem:[#allocation6_spill] sm:$0xff] %v4909_v20  ;;  %v1389_v9 = vsub.f32 %v5802_v58, %v5544_v26 }
  0xd3   :  { %v5548_v19 = vand.u32 4294901760, %v5806_v34  ;;  %v1270_v14 = vsub.f32 %v5803_v63, %v5543_v36  ;;  %v1396_v37 = vsub.f32 %v5805_v31, %v5545_v54  ;;  %v1278_v49 = vand.u32 4294901760, %v1277_v62  ;;  %v5813_v36 = vld [vmem:[#allocation28_spill] sm:$0xff] }
  0xd4   :  { %5799 = vst [vmem:[#allocation5_spill] sm:$0xff] %v4889_v24  ;;  %v1382_v56 = vsub.f32 %v5801_v4, %v5546_v12  ;;  %v1390_v11 = vand.u32 4294901760, %v1389_v9  ;;  %v1284_v30 = vsub.f32 %v5807_v51, %v5547_v8  ;;  %v5551_v26 = vand.u32 4294901760, %v5813_v36 }
  0xd5   :  { %3418 = vmatpush3.bf16.msra.mxu1 %v4863_v28  ;;  %v1271_v3 = vand.u32 4294901760, %v1270_v14  ;;  %v1403_v7 = vsub.f32 %v5806_v34, %v5548_v19  ;;  %v1397_v9 = vand.u32 4294901760, %v1396_v37  ;;  %v1291_v62 = vsub.f32 %v5811_v23, %v5549_v43 }
  0xd6   :  { %3420 = vmatprep.subr.bf16.mxu1 %v3419_v27  ;;  %v1383_v27 = vand.u32 4294901760, %v1382_v56  ;;  %v5552_v56 = vand.u32 4294901760, %v5812_v52  ;;  %v1285_v12 = vand.u32 4294901760, %v1284_v30  ;;  %v5559_v30 = vand.u32 4294901760, %v4872_v32 }
  0xd7   :  { %v1404_v14 = vand.u32 4294901760, %v1403_v7  ;;  %v4940_v54 = vpack.c.bf16 %v1278_v49, %v1271_v3  ;;  %v5558_v3 = vand.u32 4294901760, %v4616_v60  ;;  %v1292_v7 = vand.u32 4294901760, %v1291_v62 }
  0xd8   :  { %v4937_v0 = vpack.c.bf16 %v1390_v11, %v1383_v27  ;;  %v1410_v8 = vsub.f32 %v5812_v52, %v5552_v56  ;;  %v1417_v27 = vsub.f32 %v5813_v36, %v5551_v26  ;;  %v5814_v11 = vld [vmem:[#allocation29_spill] sm:$0xff]  ;;  %v5564_v43 = vand.u32 4294901760, %v4874_v46 }
  0xd9   :  { %v4948_v19 = vpack.c.bf16 %v1404_v14, %v1397_v9  ;;  %v5555_v37 = vand.u32 4294901760, %v5814_v11  ;;  %v1305_v14 = vsub.f32 %v4616_v60, %v5558_v3  ;;  %v5567_v26 = vand.u32 4294901760, %v4876_v45 }
  0xda   :  { %v1411_v49 = vand.u32 4294901760, %v1410_v8  ;;  %v1418_v18 = vand.u32 4294901760, %v1417_v27  ;;  %v4964_v56 = vpack.c.bf16 %v1292_v7, %v1285_v12  ;;  %v1424_v8 = vsub.f32 %v4872_v32, %v5559_v30 }
  0xdb   :  { %v1298_v9 = vsub.f32 %v5814_v11, %v5555_v37  ;;  %v1431_v62 = vsub.f32 %v4874_v46, %v5564_v43  ;;  %v5565_v27 = vand.u32 4294901760, %v4878_v21  ;;  %v1306_v22 = vand.u32 4294901760, %v1305_v14 }
  0xdc   :  { %v4973_v28 = vpack.c.bf16 %v1418_v18, %v1411_v49  ;;  %v1312_v3 = vsub.f32 %v4876_v45, %v5567_v26  ;;  %v1425_v12 = vand.u32 4294901760, %v1424_v8  ;;  %v5570_v18 = vand.u32 4294901760, %v4883_v42 }
  0xdd   :  { %v1299_v37 = vand.u32 4294901760, %v1298_v9  ;;  %v1432_v7 = vand.u32 4294901760, %v1431_v62  ;;  %v1319_v30 = vsub.f32 %v4878_v21, %v5565_v27  ;;  %v5573_v49 = vand.u32 4294901760, %v4885_v35 }
  0xde   :  { %v1313_v43 = vand.u32 4294901760, %v1312_v3  ;;  %v1438_v8 = vsub.f32 %v4881_v25, %v5566_v15  ;;  %v5576_v62 = vand.u32 4294901760, %v4887_v17  ;;  %v1445_v27 = vsub.f32 %v4883_v42, %v5570_v18 }
  0xdf   :  { %v4982_v13 = vpack.c.bf16 %v1306_v22, %v1299_v37  ;;  %v4986_v9 = vpack.c.bf16 %v1432_v7, %v1425_v12  ;;  %v1320_v14 = vand.u32 4294901760, %v1319_v30  ;;  %v1326_v22 = vsub.f32 %v4885_v35, %v5573_v49 }
  0xe0   :  { %v5583_v37 = vand.u32 4294901760, %v4889_v24  ;;  %v5584_v3 = vand.u32 4294901760, %v4891_v61  ;;  %v1439_v7 = vand.u32 4294901760, %v1438_v8  ;;  %v1333_v15 = vsub.f32 %v4887_v17, %v5576_v62 }
  0xe1   :  { %v5000_v30 = vpack.c.bf16 %v1320_v14, %v1313_v43  ;;  %v5587_v26 = vand.u32 4294901760, %v4893_v6  ;;  %v1446_v18 = vand.u32 4294901760, %v1445_v27  ;;  %v1327_v59 = vand.u32 4294901760, %v1326_v22 }
  0xe2   :  { %v1452_v49 = vsub.f32 %v4889_v24, %v5583_v37  ;;  %v1459_v5 = vsub.f32 %v4891_v61, %v5584_v3  ;;  %v1334_v43 = vand.u32 4294901760, %v1333_v15  ;;  %v5589_v8 = vand.u32 4294901760, %v4895_v1 }
  0xe3   :  { %v1340_v14 = vsub.f32 %v4893_v6, %v5587_v26  ;;  %v5016_v62 = vpack.c.bf16 %v1446_v18, %v1439_v7  ;;  %v5588_v22 = vand.u32 4294901760, %v4909_v20  ;;  %v5594_v3 = vand.u32 4294901760, %v4911_v57 }
  0xe4   :  { %v1453_v29 = vand.u32 4294901760, %v1452_v49  ;;  %v1460_v27 = vand.u32 4294901760, %v1459_v5  ;;  %v5019_v50 = vpack.c.bf16 %v1334_v43, %v1327_v59  ;;  %v1347_v15 = vsub.f32 %v4895_v1, %v5589_v8 }
  0xe5   :  { %5815 = vst [vmem:[#allocation9_spill] sm:$0xff] %v5016_v62  ;;  %v1341_v37 = vand.u32 4294901760, %v1340_v14  ;;  %v1466_v18 = vsub.f32 %v4909_v20, %v5588_v22  ;;  %v5595_v5 = vand.u32 4294901760, %v4919_v16  ;;  %v5596_v49 = vand.u32 4294901760, %v4921_v2 }
  0xe6   :  { %5816 = vst [vmem:[#allocation27_spill] sm:$0xff] %v5019_v50  ;;  %v5025_v26 = vpack.c.bf16 %v1460_v27, %v1453_v29  ;;  %v1348_v59 = vand.u32 4294901760, %v1347_v15  ;;  %v1473_v7 = vsub.f32 %v4911_v57, %v5594_v3 }
  0xe7   :  { %v1467_v43 = vand.u32 4294901760, %v1466_v18  ;;  %v1354_v14 = vsub.f32 %v4919_v16, %v5595_v5  ;;  %v1361_v29 = vsub.f32 %v4921_v2, %v5596_v49 }
  0xe8   :  { %5817 = vst [vmem:[#allocation10_spill] sm:$0xff] %v5025_v26  ;;  %v5041_v22 = vpack.c.bf16 %v1348_v59, %v1341_v37  ;;  %v1474_v8 = vand.u32 4294901760, %v1473_v7 }
  0xe9   :  { %v1355_v39 = vand.u32 4294901760, %v1354_v14  ;;  %v1362_v15 = vand.u32 4294901760, %v1361_v29 }
  0xea   :  { %v5043_v26 = vpack.c.bf16 %v1474_v8, %v1467_v43 }
  0xeb   :  { %v5045_v50 = vpack.c.bf16 %v1362_v15, %v1355_v39 }
 0x135   :  { %v156_v12 = vpop.f32.mrb[0].mxu1 }
 0x136   :  { %v158_v44 = vpop.f32.mrb[1].mxu1 }
 0x139   :  { %v167_v41 = vpop.f32.mrb[2].mxu1 }
 0x13a   :  { %v169_v53 = vpop.f32.mrb[3].mxu1 }
 0x13d   :  { %v178_v27 = vpop.f32.mrb[4].mxu1 }
 0x13e   :  { %v180_v33 = vpop.f32.mrb[5].mxu1 }
 0x141   :  { %v189_v18 = vpop.f32.mrb[6].mxu1 }
 0x142   :  { %v191_v3 = vpop.f32.mrb[7].mxu1 }
 0x18e   :  { %v1029_v8 = vpop.f32.mrb[0].mxu0 }
 0x18f   :  { %v3603_v29 = vadd.f32 %v1029_v8, %v156_v12  ;;  %v1031_v59 = vpop.f32.mrb[1].mxu0 }
 0x190   :  { %v3604_v37 = vadd.f32 %v1031_v59, %v158_v44 }
 0x191   :  { %v1055_v15 = vmul.f32 %v3603_v29, %v3603_v29 }
 0x192   :  { %v1056_v62 = vmul.f32 %v3604_v37, %v3604_v37  ;;  %v1036_v5 = vpop.f32.mrb[2].mxu0 }
 0x193   :  { %v5079_v49 = vand.u32 4294901760, %v1055_v15  ;;  %v3605_v35 = vadd.f32 %v1036_v5, %v167_v41  ;;  %v1038_v39 = vpop.f32.mrb[3].mxu0 }
 0x194   :  { %v5081_v24 = vand.u32 4294901760, %v1056_v62  ;;  %v3606_v7 = vadd.f32 %v1038_v39, %v169_v53 }
 0x195   :  { %v5084_v6 = vsub.f32 %v1055_v15, %v5079_v49  ;;  %v1057_v43 = vmul.f32 %v3605_v35, %v3605_v35 }
 0x196   :  { %v5087_v14 = vsub.f32 %v1056_v62, %v5081_v24  ;;  %v1058_v12 = vmul.f32 %v3606_v7, %v3606_v7  ;;  %v1043_v8 = vpop.f32.mrb[4].mxu0 }
 0x197   :  { %5818 = vst [vmem:[#allocation11_spill] sm:$0xff] %v5084_v6  ;;  %v5607_v44 = vand.u32 4294901760, %v5084_v6  ;;  %v5090_v37 = vand.u32 4294901760, %v1057_v43  ;;  %v3607_v59 = vadd.f32 %v1043_v8, %v178_v27  ;;  %v1045_v29 = vpop.f32.mrb[5].mxu0 }
 0x198   :  { %v5092_v41 = vand.u32 4294901760, %v1058_v12  ;;  %v3608_v5 = vadd.f32 %v1045_v29, %v180_v33  ;;  %v5612_v53 = vand.u32 4294901760, %v5087_v14 }
 0x199   :  { %v1200_v35 = vsub.f32 %v5084_v6, %v5607_v44  ;;  %v5099_v62 = vsub.f32 %v1057_v43, %v5090_v37  ;;  %v1059_v39 = vmul.f32 %v3607_v59, %v3607_v59 }
 0x19a   :  { %v5102_v7 = vsub.f32 %v1058_v12, %v5092_v41  ;;  %v1060_v15 = vmul.f32 %v3608_v5, %v3608_v5  ;;  %v1050_v16 = vpop.f32.mrb[6].mxu0  ;;  %v1194_v27 = vsub.f32 %v5087_v14, %v5612_v53 }
 0x19b   :  { %v5107_v33 = vand.u32 4294901760, %v1059_v39  ;;  %v3609_v8 = vadd.f32 %v1050_v16, %v189_v18  ;;  %v1052_v29 = vpop.f32.mrb[7].mxu0  ;;  %v5617_v2 = vand.u32 4294901760, %v5099_v62  ;;  %v1201_v12 = vand.u32 4294901760, %v1200_v35 }
 0x19c   :  { %v5110_v44 = vand.u32 4294901760, %v1060_v15  ;;  %v3610_v43 = vadd.f32 %v1052_v29, %v191_v3  ;;  %v1195_v6 = vand.u32 4294901760, %v1194_v27  ;;  %v5618_v59 = vand.u32 4294901760, %v5102_v7 }
 0x19d   :  { %v5114_v5 = vsub.f32 %v1059_v39, %v5107_v33  ;;  %v1061_v20 = vmul.f32 %v3609_v8, %v3609_v8  ;;  %v1215_v53 = vsub.f32 %v5099_v62, %v5617_v2  ;;  %v5860_v2 = vld [vmem:[#allocation20_spill] sm:$0xff] }
 0x19e   :  { %v5120_v16 = vsub.f32 %v1060_v15, %v5110_v44  ;;  %v1062_v18 = vmul.f32 %v3610_v43, %v3610_v43  ;;  %1196 = vmatprep.mubr.f32.mxu1 %v1195_v6  ;;  %v1209_v3 = vsub.f32 %v5102_v7, %v5618_v59  ;;  %v5861_v59 = vld [vmem:[#allocation2_spill] sm:$0xff] }
 0x19f   :  { %v5125_v27 = vand.u32 4294901760, %v1061_v20  ;;  %1202 = vmatmul.mubr.f32.vlgmr.msra.gmra.mrb[8].mxu1 %v1201_v12  ;;  %v5615_v35 = vand.u32 4294901760, %v5114_v5  ;;  %v1216_v6 = vand.u32 4294901760, %v1215_v53 }
 0x1a0   :  { %v5128_v39 = vand.u32 4294901760, %v1062_v18  ;;  %3422 = vmatpush3.bf16.msra.mxu1 %v4902_v38  ;;  %v1210_v8 = vand.u32 4294901760, %v1209_v3  ;;  %v5616_v29 = vand.u32 4294901760, %v5120_v16 }
 0x1a1   :  { %5819 = vst [vmem:[#allocation12_spill] sm:$0xff] %v5125_v27  ;;  %v5133_v15 = vsub.f32 %v1061_v20, %v5125_v27  ;;  %3424 = vmatprep.subr.bf16.mxu1 %v4937_v0  ;;  %v1230_v43 = vsub.f32 %v5114_v5, %v5615_v35  ;;  %v5858_v35 = vld [vmem:[#allocation25_spill] sm:$0xff] }
 0x1a2   :  { %v5140_v12 = vsub.f32 %v1062_v18, %v5128_v39  ;;  %1211 = vmatprep.mubr.f32.mxu1 %v1210_v8  ;;  %v1224_v38 = vsub.f32 %v5120_v16, %v5616_v29  ;;  %v5859_v29 = vld [vmem:[#allocation26_spill] sm:$0xff] }
 0x1a3   :  { %1217 = vmatmul.mubr.f32.gmra.mrb[10].mxu1 %v1216_v6  ;;  %v5613_v3 = vand.u32 4294901760, %v5133_v15  ;;  %v1231_v53 = vand.u32 4294901760, %v1230_v43  ;;  %v5821_v43 = vld [vmem:[#allocation27_spill] sm:$0xff] }
 0x1a4   :  { %3426 = vmatpush3.bf16.msra.mxu1 %v4940_v54  ;;  %v1225_v20 = vand.u32 4294901760, %v1224_v38  ;;  %v5614_v0 = vand.u32 4294901760, %v5140_v12  ;;  %v5822_v38 = vld [vmem:[#allocation10_spill] sm:$0xff] }
 0x1a5   :  { %3428 = vmatprep.subr.bf16.mxu1 %v4948_v19  ;;  %v1245_v18 = vsub.f32 %v5133_v15, %v5613_v3  ;;  %v5820_v19 = vld [vmem:[#allocation9_spill] sm:$0xff]  ;;  %v5856_v3 = vld [vmem:[#allocation23_spill] sm:$0xff] }
 0x1a6   :  { %1226 = vmatprep.mubr.f32.mxu1 %v1225_v20  ;;  %v1239_v8 = vsub.f32 %v5140_v12, %v5614_v0  ;;  %v5831_v20 = vpack.c.bf16 %v4874_v46, %v4872_v32  ;;  %v5857_v0 = vld [vmem:[#allocation24_spill] sm:$0xff] }
 0x1a7   :  { %1232 = vmatmul.mubr.f32.gmra.mrb[12].mxu1 %v1231_v53  ;;  %v1246_v54 = vand.u32 4294901760, %v1245_v18  ;;  %v5832_v53 = vpack.c.bf16 %v4878_v21, %v4876_v45  ;;  %v5833_v18 = vpack.c.bf16 %v4883_v42, %v4881_v25 }
 0x1a8   :  { %3430 = vmatpush3.bf16.msra.mxu1 %v4964_v56  ;;  %v1240_v6 = vand.u32 4294901760, %v1239_v8  ;;  %v5825_v56 = vpack.c.bf16 %v5802_v58, %v5801_v4  ;;  %v5834_v8 = vld [vmem:[#allocation4_spill] sm:$0xff] }
 0x1a9   :  { %3432 = vmatprep.subr.bf16.mxu1 %v4973_v28  ;;  %v5824_v28 = vpack.c.bf16 %v5795_v10, %v5794_v47 }
 0x1aa   :  { %1241 = vmatprep.mubr.f32.mxu1 %v1240_v6  ;;  %v5835_v6 = vpack.c.bf16 %v4887_v17, %v5834_v8 }
 0x1ab   :  { %1247 = vmatmul.mubr.f32.gmra.mrb[14].mxu1 %v1246_v54  ;;  %v5836_v54 = vld [vmem:[#allocation5_spill] sm:$0xff] }
 0x1ac   :  { %3434 = vmatpush3.bf16.msra.mxu1 %v4982_v13  ;;  %1477 = vmatprep.mubr.f32.mxu1 %v5081_v24  ;;  %v5823_v13 = vpack.c.bf16 %v5793_v55, %v5792_v40 }
 0x1ad   :  { %3436 = vmatprep.subr.bf16.mxu1 %v4986_v9  ;;  %v5828_v9 = vpack.c.bf16 %v5811_v23, %v5807_v51 }
 0x1b0   :  { %3438 = vmatpush3.bf16.msra.mxu1 %v5000_v30  ;;  %v5829_v30 = vpack.c.bf16 %v5813_v36, %v5812_v52 }
 0x1b1   :  { %3440 = vmatprep.subr.bf16.mxu1 %v5820_v19  ;;  %v5837_v19 = vpack.c.bf16 %v4891_v61, %v5836_v54 }
 0x1b4   :  { %3442 = vmatpush3.bf16.msra.mxu1 %v5821_v43  ;;  %v5838_v43 = vld [vmem:[#allocation31_spill] sm:$0xff] }
 0x1b5   :  { %3444 = vmatprep.subr.bf16.mxu1 %v5822_v38  ;;  %v5839_v38 = vpack.c.bf16 %v4895_v1, %v5838_v43 }
 0x1b8   :  { %3446 = vmatpush3.bf16.msra.mxu1 %v5041_v22  ;;  %v5830_v22 = vpack.c.bf16 %v4616_v60, %v5814_v11 }
 0x1b9   :  { %3448 = vmatprep.subr.bf16.mxu1 %v5043_v26  ;;  %v5827_v26 = vpack.c.bf16 %v5806_v34, %v5805_v31 }
 0x1bc   :  { %3450 = vmatpush3.bf16.msra.mxu1 %v5045_v50  ;;  %v5826_v50 = vpack.c.bf16 %v5804_v48, %v5803_v63 }
 0x1bd   :  { %3452 = vmatprep.subr.bf16.mxu1 %v5823_v13  ;;  %v5840_v13 = vld [vmem:[#allocation6_spill] sm:$0xff] }
 0x1bf   :  { %1479 = vmatmul.mubr.f32.vlgmr.msra.gmra.mrb[16].mxu1 %v5079_v49 }
 0x1c0   :  { %1484 = vmatprep.mubr.f32.mxu1 %v5092_v41  ;;  %3454 = vmatpush3.bf16.msra.mxu1 %v5824_v28  ;;  %v5841_v28 = vpack.c.bf16 %v4911_v57, %v5840_v13 }
 0x1c1   :  { %3456 = vmatprep.subr.bf16.mxu1 %v5825_v56  ;;  %v5842_v56 = vld [vmem:[#allocation8_spill] sm:$0xff] }
 0x1c3   :  { %1486 = vmatmul.mubr.f32.gmra.mrb[18].mxu1 %v5090_v37 }
 0x1c4   :  { %1491 = vmatprep.mubr.f32.mxu1 %v5110_v44  ;;  %3458 = vmatpush3.bf16.msra.mxu1 %v5826_v50  ;;  %v5843_v50 = vld [vmem:[#allocation7_spill] sm:$0xff] }
 0x1c5   :  { %3460 = vmatprep.subr.bf16.mxu1 %v5827_v26  ;;  %v5844_v26 = vpack.c.bf16 %v5842_v56, %v5843_v50 }
 0x1c7   :  { %1493 = vmatmul.mubr.f32.gmra.mrb[20].mxu1 %v5107_v33 }
 0x1c8   :  { %1498 = vmatprep.mubr.f32.mxu1 %v5128_v39  ;;  %3462 = vmatpush3.bf16.msra.mxu1 %v5828_v9  ;;  %v5845_v9 = vld [vmem:[#allocation14_spill] sm:$0xff] }
 0x1c9   :  { %3464 = vmatprep.subr.bf16.mxu1 %v5829_v30  ;;  %v5846_v30 = vld [vmem:[#allocation11_spill] sm:$0xff] }
 0x1cb   :  { %1500 = vmatmul.mubr.f32.gmra.mrb[22].mxu1 %v5125_v27  ;;  %v5862_v27 = vand.u32 4294901760, %v5792_v40  ;;  %v5870_v40 = vand.u32 4294901760, %v5102_v7 }
 0x1cc   :  { %3466 = vmatpush3.bf16.msra.mxu1 %v5830_v22  ;;  %1635 = vmatprep.mubr.f32.mxu1 %v5087_v14  ;;  %v5847_v22 = vld [vmem:[#allocation15_spill] sm:$0xff] }
 0x1cd   :  { %3468 = vmatprep.subr.bf16.mxu1 %v5831_v20  ;;  %v5848_v20 = vld [vmem:[#allocation16_spill] sm:$0xff] }
 0x1d0   :  { %3470 = vmatpush3.bf16.msra.mxu1 %v5832_v53  ;;  %v5849_v53 = vld [vmem:[#allocation17_spill] sm:$0xff] }
 0x1d1   :  { %3472 = vmatprep.subr.bf16.mxu1 %v5833_v18  ;;  %v5850_v18 = vld [vmem:[#allocation18_spill] sm:$0xff] }
 0x1d4   :  { %3474 = vmatpush3.bf16.msra.mxu1 %v5835_v6  ;;  %v5851_v6 = vld [vmem:[#allocation19_spill] sm:$0xff] }
 0x1d5   :  { %3476 = vmatprep.subr.bf16.mxu1 %v5837_v19  ;;  %v5852_v19 = vld [vmem:[#allocation21_spill] sm:$0xff] }
 0x1d8   :  { %3478 = vmatpush3.bf16.msra.mxu1 %v5839_v38  ;;  %v5853_v38 = vld [vmem:[#allocation30_spill] sm:$0xff] }
 0x1d9   :  { %3480 = vmatprep.subr.bf16.mxu1 %v5841_v28  ;;  %v5854_v28 = vand.u32 4294901760, %v5087_v14 }
 0x1dc   :  { %3482 = vmatpush3.bf16.msra.mxu1 %v5844_v26  ;;  %v5855_v26 = vld [vmem:[#allocation22_spill] sm:$0xff] }
 0x1dd   :  { %3484 = vmatprep.subr.bf16.mxu1 %v5845_v9 }
 0x1df   :  { %1638 = vmatmul.mubr.f32.vlgmr.msra.gmra.mrb[24].mxu1 %v5846_v30 }
 0x1e0   :  { %1644 = vmatprep.mubr.f32.mxu1 %v5102_v7  ;;  %3486 = vmatpush3.bf16.msra.mxu1 %v5847_v22  ;;  %v5877_v7 = vand.u32 4294901760, %v5807_v51  ;;  %v5884_v51 = vand.u32 4294901760, %v4616_v60  ;;  %v5890_v60 = vand.u32 4294901760, %v4881_v25  ;;  %v5897_v25 = vand.u32 4294901760, %v4895_v1  ;;  %v5903_v1 = vld [vmem:[#allocation30_spill] sm:$0xff] }
 0x1e1   :  { %3488 = vmatprep.subr.bf16.mxu1 %v5848_v20 }
 0x1e3   :  { %1647 = vmatmul.mubr.f32.gmra.mrb[26].mxu1 %v5099_v62 }
 0x1e4   :  { %1653 = vmatprep.mubr.f32.mxu1 %v5120_v16  ;;  %3490 = vmatpush3.bf16.msra.mxu1 %v5849_v53 }
 0x1e5   :  { %3492 = vmatprep.subr.bf16.mxu1 %v5850_v18 }
 0x1e7   :  { %1656 = vmatmul.mubr.f32.gmra.mrb[28].mxu1 %v5114_v5 }
 0x1e8   :  { %1662 = vmatprep.mubr.f32.mxu1 %v5140_v12  ;;  %3494 = vmatpush3.bf16.msra.mxu1 %v5851_v6 }
 0x1e9   :  { %3496 = vmatprep.subr.bf16.mxu1 %v5852_v19 }
 0x1eb   :  { %1665 = vmatmul.mubr.f32.gmra.mrb[30].mxu1 %v5133_v15 }
 0x1ec   :  { %3498 = vmatpush3.bf16.msra.mxu1 %v5853_v38  ;;  %1769 = vmatprep.mubr.f32.mxu1 %v5854_v28  ;;  %v5863_v38 = vand.u32 4294901760, %v5793_v55  ;;  %v5864_v28 = vld [vmem:[#allocation3_spill] sm:$0xff]  ;;  %v5871_v55 = vand.u32 4294901760, %v5803_v63  ;;  %v5878_v63 = vand.u32 4294901760, %v5811_v23  ;;  %v5885_v23 = vand.u32 4294901760, %v4872_v32 }
 0x1ed   :  { %3500 = vmatprep.subr.bf16.mxu1 %v5855_v26  ;;  %v5865_v26 = vand.u32 4294901760, %v5794_v47  ;;  %v5872_v47 = vand.u32 4294901760, %v5804_v48  ;;  %v5879_v48 = vand.u32 4294901760, %v5812_v52  ;;  %v5886_v52 = vand.u32 4294901760, %v4874_v46 }
 0x1ee   :  { %v3515_v14 = vpack.c.bf16 %v5863_v38, %v5862_v27  ;;  %v5892_v46 = vand.u32 4294901760, %v5834_v8  ;;  %v5899_v8 = vand.u32 4294901760, %v4911_v57  ;;  %v5904_v57 = vld [vmem:[#allocation22_spill] sm:$0xff] }
 0x1ef   :  { %v3521_v27 = vpack.c.bf16 %v5872_v47, %v5871_v55 }
 0x1f0   :  { %3502 = vmatpush3.bf16.msra.mxu1 %v5856_v3  ;;  %v5866_v3 = vand.u32 4294901760, %v5795_v10  ;;  %v5873_v10 = vand.u32 4294901760, %v5805_v31  ;;  %v5880_v31 = vand.u32 4294901760, %v5813_v36  ;;  %v5887_v36 = vand.u32 4294901760, %v5133_v15 }
 0x1f1   :  { %3504 = vmatprep.subr.bf16.mxu1 %v5857_v0  ;;  %v5893_v15 = vand.u32 4294901760, %v4887_v17  ;;  %v5900_v17 = vand.u32 4294901760, %v5843_v50  ;;  %v5908_v50 = vld [vmem:[#allocation26_spill] sm:$0xff] }
 0x1f2   :  { %v3517_v0 = vpack.c.bf16 %v5866_v3, %v5865_v26  ;;  %v5894_v26 = vand.u32 4294901760, %v5836_v54  ;;  %v5901_v54 = vand.u32 4294901760, %v5842_v56  ;;  %v5907_v56 = vld [vmem:[#allocation25_spill] sm:$0xff] }
 0x1f3   :  { %v3537_v38 = vpack.c.bf16 %v5893_v15, %v5892_v46 }
 0x1f4   :  { %3506 = vmatpush3.bf16.msra.mxu1 %v5858_v35  ;;  %v5867_v35 = vand.u32 4294901760, %v5801_v4  ;;  %v5874_v4 = vand.u32 4294901760, %v5806_v34  ;;  %v5881_v34 = vand.u32 4294901760, %v5114_v5  ;;  %v5888_v5 = vand.u32 4294901760, %v4876_v45 }
 0x1f5   :  { %3508 = vmatprep.subr.bf16.mxu1 %v5859_v29  ;;  %v5868_v29 = vand.u32 4294901760, %v5802_v58  ;;  %v5875_v58 = vand.u32 4294901760, %v5099_v62  ;;  %v5882_v62 = vand.u32 4294901760, %v5140_v12  ;;  %v5889_v12 = vand.u32 4294901760, %v4878_v21 }
 0x1f6   :  { %v3523_v3 = vpack.c.bf16 %v5874_v4, %v5873_v10  ;;  %v5895_v45 = vand.u32 4294901760, %v4891_v61  ;;  %v5896_v21 = vand.u32 4294901760, %v5838_v43  ;;  %v3545_v47 = vpack.c.bf16 %v5901_v54, %v5900_v17  ;;  %v5902_v61 = vld [vmem:[#allocation12_spill] sm:$0xff]  ;;  %v5905_v43 = vld [vmem:[#allocation23_spill] sm:$0xff] }
 0x1f8   :  { %3510 = vmatpush3.bf16.msra.mxu1 %v5860_v2  ;;  %v3519_v2 = vpack.c.bf16 %v5868_v29, %v5867_v35  ;;  %v3525_v35 = vpack.c.bf16 %v5878_v63, %v5877_v7 }
 0x1f9   :  { %3512 = vmatprep.subr.bf16.mxu1 %v5861_v59  ;;  %v5869_v59 = vand.u32 4294901760, %v5846_v30  ;;  %v5891_v30 = vand.u32 4294901760, %v4883_v42  ;;  %v5898_v42 = vand.u32 4294901760, %v5840_v13  ;;  %v5906_v13 = vld [vmem:[#allocation24_spill] sm:$0xff] }
 0x1fb   :  { %v3535_v32 = vpack.c.bf16 %v5891_v30, %v5890_v60  ;;  %v3543_v55 = vpack.c.bf16 %v5899_v8, %v5898_v42 }
 0x1fc   :  { %3514 = vmatpush3.bf16.msra.mxu1 %v5864_v28 }
 0x1fd   :  { %3516 = vmatprep.subr.bf16.mxu1 %v3515_v14  ;;  %v3539_v14 = vpack.c.bf16 %v5895_v45, %v5894_v26 }
 0x1ff   :  { %1773 = vmatmul.mubr.f32.vlgmr.msra.gmra.mrb[32].mxu1 %v5869_v59  ;;  %v5876_v59 = vand.u32 4294901760, %v5120_v16  ;;  %v5883_v16 = vand.u32 4294901760, %v5814_v11  ;;  %v3533_v11 = vpack.c.bf16 %v5889_v12, %v5888_v5 }
 0x200   :  { %1780 = vmatprep.mubr.f32.mxu1 %v5870_v40  ;;  %3518 = vmatpush3.bf16.msra.mxu1 %v3517_v0  ;;  %v3531_v0 = vpack.c.bf16 %v5886_v52, %v5885_v23  ;;  %v3541_v40 = vpack.c.bf16 %v5897_v25, %v5896_v21 }
 0x201   :  { %3520 = vmatprep.subr.bf16.mxu1 %v3519_v2  ;;  %v3527_v2 = vpack.c.bf16 %v5880_v31, %v5879_v48  ;;  %v3529_v29 = vpack.c.bf16 %v5884_v51, %v5883_v16 }
 0x203   :  { %1784 = vmatmul.mubr.f32.gmra.mrb[34].mxu1 %v5875_v58 }
 0x204   :  { %1791 = vmatprep.mubr.f32.mxu1 %v5876_v59  ;;  %3522 = vmatpush3.bf16.msra.mxu1 %v3521_v27 }
 0x205   :  { %3524 = vmatprep.subr.bf16.mxu1 %v3523_v3 }
 0x207   :  { %1795 = vmatmul.mubr.f32.gmra.mrb[36].mxu1 %v5881_v34 }
 0x208   :  { %1802 = vmatprep.mubr.f32.mxu1 %v5882_v62  ;;  %3526 = vmatpush3.bf16.msra.mxu1 %v3525_v35 }
 0x209   :  { %3528 = vmatprep.subr.bf16.mxu1 %v3527_v2 }
 0x20b   :  { %1806 = vmatmul.mubr.f32.gmra.mrb[38].mxu1 %v5887_v36  ;;  %v2134_v36 = vld [vmem:[%s5427_s3 + $0x8] sm:$0xff] }
 0x20c   :  { %3530 = vmatpush3.bf16.msra.mxu1 %v3529_v29  ;;  %1972 = vmatprep.mubr.f32.mxu1 %v5081_v24  ;;  %v2152_v12 = vand.u32 4294901760, %v2134_v36 }
 0x20d   :  { %3532 = vmatprep.subr.bf16.mxu1 %v3531_v0  ;;  %v2133_v0 = vld [vmem:[%s5427_s3] sm:$0xff] }
 0x20e   :  { %v2149_v5 = vand.u32 4294901760, %v2133_v0 }
 0x210   :  { %3534 = vmatpush3.bf16.msra.mxu1 %v3533_v11  ;;  %v5364_v11 = vpack.c.bf16 %v2152_v12, %v2149_v5  ;;  %v2257_v30 = vsub.f32 %v2133_v0, %v2149_v5 }
 0x211   :  { %3536 = vmatprep.subr.bf16.mxu1 %v3535_v32  ;;  %v2264_v32 = vsub.f32 %v2134_v36, %v2152_v12 }
 0x212   :  { %3580 = vmatprep.subr.bf16.mxu0 %v5364_v11 }
 0x213   :  { %3582 = vmatpush3.bf16.msra.mxu0 %v5364_v11  ;;  %v2265_v26 = vand.u32 4294901760, %v2264_v32 }
 0x214   :  { %3538 = vmatpush3.bf16.msra.mxu1 %v3537_v38  ;;  %v2258_v38 = vand.u32 4294901760, %v2257_v30 }
 0x215   :  { %3540 = vmatprep.subr.bf16.mxu1 %v3539_v14  ;;  %v2266_v25 = vsub.f32 %v2264_v32, %v2265_v26 }
 0x216   :  { %v2259_v21 = vsub.f32 %v2257_v30, %v2258_v38 }
 0x218   :  { %3542 = vmatpush3.bf16.msra.mxu1 %v3541_v40  ;;  %v2260_v8 = vand.u32 4294901760, %v2259_v21 }
 0x219   :  { %3544 = vmatprep.subr.bf16.mxu1 %v3543_v55  ;;  %v2267_v55 = vand.u32 4294901760, %v2266_v25 }
 0x21c   :  { %3546 = vmatpush3.bf16.msra.mxu1 %v3545_v47  ;;  %v5368_v47 = vpack.c.bf16 %v2267_v55, %v2260_v8 }
 0x21d   :  { %3548 = vmatprep.subr.bf16.mxu1 %v5845_v9  ;;  %v5909_v9 = vld [vmem:[#allocation20_spill] sm:$0xff] }
 0x21e   :  { %3584 = vmatprep.subr.bf16.mxu0 %v5368_v47 }
 0x21f   :  { %1974 = vmatmul.mubr.f32.vlgmr.msra.gmra.mrb[40].mxu1 %v5079_v49 }
 0x220   :  { %1979 = vmatprep.mubr.f32.mxu1 %v5092_v41  ;;  %3550 = vmatpush3.bf16.msra.mxu1 %v5847_v22  ;;  %v5910_v22 = vld [vmem:[#allocation2_spill] sm:$0xff] }
 0x221   :  { %3552 = vmatprep.subr.bf16.mxu1 %v5848_v20 }
 0x223   :  { %1981 = vmatmul.mubr.f32.gmra.mrb[42].mxu1 %v5090_v37 }
 0x224   :  { %1986 = vmatprep.mubr.f32.mxu1 %v5110_v44  ;;  %3554 = vmatpush3.bf16.msra.mxu1 %v5849_v53 }
 0x225   :  { %3556 = vmatprep.subr.bf16.mxu1 %v5850_v18 }
 0x227   :  { %1988 = vmatmul.mubr.f32.gmra.mrb[44].mxu1 %v5107_v33 }
 0x228   :  { %1993 = vmatprep.mubr.f32.mxu1 %v5128_v39  ;;  %3558 = vmatpush3.bf16.msra.mxu1 %v5851_v6 }
 0x229   :  { %3560 = vmatprep.subr.bf16.mxu1 %v5852_v19 }
 0x22b   :  { %1995 = vmatmul.mubr.f32.gmra.mrb[46].mxu1 %v5902_v61 }
 0x22c   :  { %3562 = vmatpush3.bf16.msra.mxu1 %v5903_v1  ;;  %2097 = vmatprep.mubr.f32.mxu1 %v5081_v24 }
 0x22d   :  { %3564 = vmatprep.subr.bf16.mxu1 %v5904_v57  ;;  %v5371_v57 = vpack.c.bf16 %v2264_v32, %v2257_v30 }
 0x230   :  { %3566 = vmatpush3.bf16.msra.mxu1 %v5905_v43 }
 0x231   :  { %3568 = vmatprep.subr.bf16.mxu1 %v5906_v13 }
 0x234   :  { %3570 = vmatpush3.bf16.msra.mxu1 %v5907_v56 }
 0x235   :  { %3572 = vmatprep.subr.bf16.mxu1 %v5908_v50 }
 0x238   :  { %3574 = vmatpush3.bf16.msra.mxu1 %v5909_v9 }
 0x239   :  { %3576 = vmatprep.subr.bf16.mxu1 %v5910_v22  ;;  %v5373_v22 = vpack.c.bf16 %v2265_v26, %v2258_v38 }
 0x23c   :  { %3578 = vmatpush3.bf16.msra.mxu1 %v5864_v28 }
 0x23f   :  { %2099 = vmatmul.mubr.f32.vlgmr.msra.gmra.mrb[48].mxu1 %v5079_v49 }
 0x240   :  { %2104 = vmatprep.mubr.f32.mxu1 %v5092_v41 }
 0x243   :  { %2106 = vmatmul.mubr.f32.gmra.mrb[50].mxu1 %v5090_v37 }
 0x244   :  { %2111 = vmatprep.mubr.f32.mxu1 %v5110_v44 }
 0x247   :  { %2113 = vmatmul.mubr.f32.gmra.mrb[52].mxu1 %v5107_v33 }
 0x248   :  { %2118 = vmatprep.mubr.f32.mxu1 %v5128_v39 }
 0x24b   :  { %2120 = vmatmul.mubr.f32.gmra.mrb[54].mxu1 %v5902_v61 }
 0x272   :  { %v2867_v24 = vpop.f32.mrb[8].mxu1 }
 0x273   :  { %v2868_v20 = vpop.f32.mrb[9].mxu1 }
 0x274   :  { %v2869_v53 = vadd.f32 %v2868_v20, %v2867_v24 }
 0x276   :  { %v2870_v18 = vpop.f32.mrb[10].mxu1  ;;  %v1204_v3 = vadd.f32 1e-06, %v2869_v53 }
 0x277   :  { %v2871_v6 = vpop.f32.mrb[11].mxu1 }
 0x278   :  { %v2872_v19 = vadd.f32 %v2871_v6, %v2870_v18 }
 0x27a   :  { %v2873_v28 = vpop.f32.mrb[12].mxu1  ;;  %v1219_v7 = vadd.f32 1e-06, %v2872_v19 }
 0x27b   :  { %v2874_v49 = vpop.f32.mrb[13].mxu1 }
 0x27c   :  { %v2875_v27 = vadd.f32 %v2874_v49, %v2873_v28 }
 0x27e   :  { %v2876_v41 = vpop.f32.mrb[14].mxu1  ;;  %v1234_v2 = vadd.f32 1e-06, %v2875_v27 }
 0x27f   :  { %v2877_v10 = vpop.f32.mrb[15].mxu1 }
 0x280   :  { %v2878_v37 = vadd.f32 %v2877_v10, %v2876_v41 }
 0x282   :  { %v1249_v29 = vadd.f32 1e-06, %v2878_v37 }
 0x292   :  { %v2911_v4 = vpop.f32.mrb[16].mxu1 }
 0x293   :  { %v2912_v44 = vpop.f32.mrb[17].mxu1 }
 0x294   :  { %v2913_v33 = vadd.f32 %v2912_v44, %v2911_v4 }
 0x296   :  { %v1481_v58 = vadd.f32 %v2913_v33, %v1204_v3  ;;  %v2914_v39 = vpop.f32.mrb[18].mxu1 }
 0x297   :  { %v2915_v59 = vpop.f32.mrb[19].mxu1 }
 0x298   :  { %v2916_v63 = vadd.f32 %v2915_v59, %v2914_v39 }
 0x29a   :  { %v1488_v35 = vadd.f32 %v2916_v63, %v1219_v7  ;;  %v2917_v48 = vpop.f32.mrb[20].mxu1 }
 0x29b   :  { %v2918_v31 = vpop.f32.mrb[21].mxu1 }
 0x29c   :  { %v2919_v34 = vadd.f32 %v2918_v31, %v2917_v48 }
 0x29e   :  { %v1495_v62 = vadd.f32 %v2919_v34, %v1234_v2  ;;  %v2920_v16 = vpop.f32.mrb[22].mxu1 }
 0x29f   :  { %v2921_v51 = vpop.f32.mrb[23].mxu1 }
 0x2a0   :  { %v2922_v23 = vadd.f32 %v2921_v51, %v2920_v16 }
 0x2a2   :  { %v1502_v52 = vadd.f32 %v2922_v23, %v1249_v29 }
 0x2b2   :  { %v2955_v60 = vpop.f32.mrb[24].mxu1 }
 0x2b3   :  { %v2956_v46 = vpop.f32.mrb[25].mxu1 }
 0x2b4   :  { %v2957_v15 = vadd.f32 %v2956_v46, %v2955_v60 }
 0x2b6   :  { %v1640_v45 = vadd.f32 %v2957_v15, %v1481_v58  ;;  %v2958_v14 = vpop.f32.mrb[26].mxu1 }
 0x2b7   :  { %v2959_v40 = vpop.f32.mrb[27].mxu1 }
 0x2b8   :  { %v2960_v42 = vadd.f32 %v2959_v40, %v2958_v14 }
 0x2ba   :  { %v1649_v17 = vadd.f32 %v2960_v42, %v1488_v35  ;;  %v2961_v54 = vpop.f32.mrb[28].mxu1 }
 0x2bb   :  { %v2962_v61 = vpop.f32.mrb[29].mxu1 }
 0x2bc   :  { %v2963_v1 = vadd.f32 %v2962_v61, %v2961_v54 }
 0x2be   :  { %v1658_v43 = vadd.f32 %v2963_v1, %v1495_v62  ;;  %v2964_v13 = vpop.f32.mrb[30].mxu1 }
 0x2bf   :  { %v2965_v56 = vpop.f32.mrb[31].mxu1 }
 0x2c0   :  { %v2966_v50 = vadd.f32 %v2965_v56, %v2964_v13 }
 0x2c2   :  { %v1667_v9 = vadd.f32 %v2966_v50, %v1502_v52 }
 0x2d2   :  { %v2999_v24 = vpop.f32.mrb[32].mxu1 }
 0x2d3   :  { %v3000_v20 = vpop.f32.mrb[33].mxu1 }
 0x2d4   :  { %v3001_v53 = vadd.f32 %v3000_v20, %v2999_v24 }
 0x2d6   :  { %v1775_v18 = vadd.f32 %v3001_v53, %v1640_v45  ;;  %v3002_v6 = vpop.f32.mrb[34].mxu1 }
 0x2d7   :  { %v3003_v19 = vpop.f32.mrb[35].mxu1 }
 0x2d8   :  { %v3004_v28 = vadd.f32 %v3003_v19, %v3002_v6 }
 0x2da   :  { %v1786_v49 = vadd.f32 %v3004_v28, %v1649_v17  ;;  %v3005_v27 = vpop.f32.mrb[36].mxu1 }
 0x2db   :  { %v3006_v41 = vpop.f32.mrb[37].mxu1 }
 0x2dc   :  { %v3007_v10 = vadd.f32 %v3006_v41, %v3005_v27 }
 0x2de   :  { %v1797_v37 = vadd.f32 %v3007_v10, %v1658_v43  ;;  %v3008_v4 = vpop.f32.mrb[38].mxu1 }
 0x2df   :  { %v3009_v44 = vpop.f32.mrb[39].mxu1 }
 0x2e0   :  { %v3010_v3 = vadd.f32 %v3009_v44, %v3008_v4 }
 0x2e2   :  { %v1808_v33 = vadd.f32 %v3010_v3, %v1667_v9 }
 0x2f2   :  { %v3043_v58 = vpop.f32.mrb[40].mxu1 }
 0x2f3   :  { %v3044_v39 = vpop.f32.mrb[41].mxu1 }
 0x2f4   :  { %v3045_v59 = vadd.f32 %v3044_v39, %v3043_v58 }
 0x2f6   :  { %v1976_v7 = vadd.f32 %v3045_v59, %v1775_v18  ;;  %v3046_v63 = vpop.f32.mrb[42].mxu1 }
 0x2f7   :  { %v3047_v35 = vpop.f32.mrb[43].mxu1 }
 0x2f8   :  { %v3048_v48 = vadd.f32 %v3047_v35, %v3046_v63 }
 0x2fa   :  { %v1983_v31 = vadd.f32 %v3048_v48, %v1786_v49  ;;  %v3049_v2 = vpop.f32.mrb[44].mxu1 }
 0x2fb   :  { %v3050_v34 = vpop.f32.mrb[45].mxu1 }
 0x2fc   :  { %v3051_v62 = vadd.f32 %v3050_v34, %v3049_v2 }
 0x2fe   :  { %v1990_v16 = vadd.f32 %v3051_v62, %v1797_v37  ;;  %v3052_v51 = vpop.f32.mrb[46].mxu1 }
 0x2ff   :  { %v3053_v29 = vpop.f32.mrb[47].mxu1 }
 0x300   :  { %v3054_v23 = vadd.f32 %v3053_v29, %v3052_v51 }
 0x302   :  { %v1997_v52 = vadd.f32 %v3054_v23, %v1808_v33 }
 0x312   :  { %v3087_v0 = vpop.f32.mrb[48].mxu1 }
 0x313   :  { %v3088_v36 = vpop.f32.mrb[49].mxu1 }
 0x314   :  { %v3089_v5 = vadd.f32 %v3088_v36, %v3087_v0 }
 0x316   :  { %v2101_v12 = vadd.f32 %v3089_v5, %v1976_v7  ;;  %v3090_v60 = vpop.f32.mrb[50].mxu1 }
 0x317   :  { %v3091_v30 = vpop.f32.mrb[51].mxu1 }
 0x318   :  { %3664 = vlog2.f32 %v2101_v12  ;;  %v3092_v32 = vadd.f32 %v3091_v30, %v3090_v60 }
 0x31a   :  { %v2108_v46 = vadd.f32 %v3092_v32, %v1983_v31  ;;  %v3093_v15 = vpop.f32.mrb[52].mxu1 }
 0x31b   :  { %v3094_v38 = vpop.f32.mrb[53].mxu1 }
 0x31c   :  { %3666 = vlog2.f32 %v2108_v46  ;;  %v3095_v26 = vadd.f32 %v3094_v38, %v3093_v15 }
 0x31e   :  { %v2115_v45 = vadd.f32 %v3095_v26, %v1990_v16  ;;  %v3096_v14 = vpop.f32.mrb[54].mxu1 }
 0x31f   :  { %v3097_v21 = vpop.f32.mrb[55].mxu1 }
 0x320   :  { %3668 = vlog2.f32 %v2115_v45  ;;  %v3098_v25 = vadd.f32 %v3097_v21, %v3096_v14 }
 0x322   :  { %v3665_v40 = vpop.eup %3664  ;;  %v2122_v42 = vadd.f32 %v3098_v25, %v1997_v52 }
 0x323   :  { %v2126_v8 = vmul.f32 0.6931472, %v3665_v40 }
 0x324   :  { %3670 = vlog2.f32 %v2122_v42 }
 0x325   :  { %v2137_v55 = vsel %vm2135_vm0, %v2126_v8, 0 }
 0x326   :  { %v3667_v17 = vpop.eup %3666  ;;  %v2215_v54 = vand.u32 4294901760, %v2137_v55 }
 0x327   :  { %v2128_v61 = vmul.f32 0.6931472, %v3667_v17 }
 0x328   :  { %v2216_v1 = vsub.f32 %v2137_v55, %v2215_v54 }
 0x329   :  { %v2140_v43 = vsel %vm2135_vm0, %v2128_v61, 0 }
 0x32a   :  { %v3669_v13 = vpop.eup %3668  ;;  %v2225_v56 = vand.u32 4294901760, %v2140_v43  ;;  %v2217_v50 = vand.u32 4294901760, %v2216_v1 }
 0x32b   :  { %v2130_v9 = vmul.f32 0.6931472, %v3669_v13 }
 0x32c   :  { %v2226_v24 = vsub.f32 %v2140_v43, %v2225_v56  ;;  %v2218_v20 = vsub.f32 %v2216_v1, %v2217_v50 }
 0x32d   :  { %v2143_v53 = vsel %vm2135_vm0, %v2130_v9, 0 }
 0x32e   :  { %v3671_v18 = vpop.eup %3670  ;;  %v2227_v6 = vand.u32 4294901760, %v2226_v24  ;;  %v2235_v19 = vand.u32 4294901760, %v2143_v53  ;;  %v2219_v28 = vand.u32 4294901760, %v2218_v20 }
 0x32f   :  { %v2132_v49 = vmul.f32 0.6931472, %v3671_v18 }
 0x330   :  { %v2236_v27 = vsub.f32 %v2143_v53, %v2235_v19  ;;  %3139 = vmatprep.mubr.f32.mxu0 %v2219_v28  ;;  %v2228_v41 = vsub.f32 %v2226_v24, %v2227_v6 }
 0x331   :  { %v2146_v10 = vsel %vm2135_vm0, %v2132_v49, 0 }
 0x332   :  { %v2245_v37 = vand.u32 4294901760, %v2146_v10  ;;  %v2229_v4 = vand.u32 4294901760, %v2228_v41  ;;  %v2237_v44 = vand.u32 4294901760, %v2236_v27 }
 0x334   :  { %v2246_v3 = vsub.f32 %v2146_v10, %v2245_v37  ;;  %3140 = vmatmul.mubr.f32.vlgmr.msra.gmra.mrb[8].mxu0 %v2229_v4  ;;  %v2238_v33 = vsub.f32 %v2236_v27, %v2237_v44 }
 0x335   :  { %3586 = vmatpush3.bf16.msra.mxu0 %v5368_v47 }
 0x336   :  { %v2239_v58 = vand.u32 4294901760, %v2238_v33  ;;  %v2247_v39 = vand.u32 4294901760, %v2246_v3  ;;  %3588 = vmatprep.subr.bf16.mxu0 %v5371_v57 }
 0x338   :  { %3142 = vmatprep.mubr.f32.mxu0 %v2239_v58  ;;  %v2248_v59 = vsub.f32 %v2246_v3, %v2247_v39 }
 0x33a   :  { %v2249_v7 = vand.u32 4294901760, %v2248_v59 }
 0x33c   :  { %3143 = vmatmul.mubr.f32.gmra.mrb[10].mxu0 %v2249_v7  ;;  %v2831_v7 = vld [vmem:[%s5427_s3 + $0x10] sm:$0xff] }
 0x33d   :  { %3149 = vmatprep.mubr.f32.mxu0 %v2215_v54 }
 0x340   :  { %3150 = vmatmul.mubr.f32.vlgmr.msra.gmra.mrb[8].mxu0 %v2225_v56 }
 0x341   :  { %3590 = vmatpush3.bf16.msra.mxu0 %v5371_v57  ;;  %3152 = vmatprep.mubr.f32.mxu0 %v2235_v19 }
 0x342   :  { %3592 = vmatprep.subr.bf16.mxu0 %v5364_v11 }
 0x344   :  { %3153 = vmatmul.mubr.f32.gmra.mrb[10].mxu0 %v2245_v37 }
 0x345   :  { %3159 = vmatprep.mubr.f32.mxu0 %v2216_v1 }
 0x348   :  { %3160 = vmatmul.mubr.f32.vlgmr.msra.gmra.mrb[8].mxu0 %v2226_v24 }
 0x349   :  { %3594 = vmatpush3.bf16.msra.mxu0 %v5364_v11  ;;  %3162 = vmatprep.mubr.f32.mxu0 %v2236_v27 }
 0x34a   :  { %3596 = vmatprep.subr.bf16.mxu0 %v5373_v22 }
 0x34c   :  { %3163 = vmatmul.mubr.f32.gmra.mrb[10].mxu0 %v2246_v3 }
 0x34d   :  { %3169 = vmatprep.mubr.f32.mxu0 %v2217_v50 }
 0x350   :  { %3170 = vmatmul.mubr.f32.vlgmr.msra.gmra.mrb[8].mxu0 %v2227_v6 }
 0x351   :  { %3598 = vmatpush3.bf16.msra.mxu0 %v5373_v22  ;;  %3172 = vmatprep.mubr.f32.mxu0 %v2237_v44 }
 0x352   :  { %3600 = vmatprep.subr.bf16.mxu0 %v5364_v11 }
 0x354   :  { %3173 = vmatmul.mubr.f32.gmra.mrb[10].mxu0 %v2247_v39 }
 0x355   :  { %3179 = vmatprep.mubr.f32.mxu0 %v2215_v54 }
 0x358   :  { %3180 = vmatmul.mubr.f32.vlgmr.msra.gmra.mrb[8].mxu0 %v2225_v56 }
 0x359   :  { %3602 = vmatpush3.bf16.msra.mxu0 %v5364_v11  ;;  %3182 = vmatprep.mubr.f32.mxu0 %v2235_v19 }
 0x35c   :  { %3183 = vmatmul.mubr.f32.gmra.mrb[10].mxu0 %v2245_v37 }
 0x35d   :  { %3189 = vmatprep.mubr.f32.mxu0 %v2215_v54 }
 0x360   :  { %3190 = vmatmul.mubr.f32.vlgmr.msra.gmra.mrb[8].mxu0 %v2225_v56 }
 0x361   :  { %3192 = vmatprep.mubr.f32.mxu0 %v2235_v19 }
 0x364   :  { %3193 = vmatmul.mubr.f32.gmra.mrb[10].mxu0 %v2245_v37 }
 0x433   :  { %v3191_v47 = vpop.f32.mrb[8].mxu0 }
 0x434   :  { %v2714_v57 = vpop.f32.mrb[9].mxu0  ;;  %v2740_v48 = vsel %vm2736_vm1, %v3191_v47, 0.0 }
 0x435   :  { %v2737_v63 = vsel %vm2736_vm1, %v2714_v57, 0.0 }
 0x436   :  { %2738 = vadd.xlane.f32.xlu0 %v2737_v63 }
 0x437   :  { %v3194_v22 = vpop.f32.mrb[10].mxu0 }
 0x438   :  { %v2726_v35 = vpop.f32.mrb[11].mxu0  ;;  %v2746_v11 = vsel %vm2736_vm1, %v3194_v22, 0.0 }
 0x439   :  { %v2743_v31 = vsel %vm2736_vm1, %v2726_v35, 0.0 }
 0x43a   :  { %2741 = vadd.xlane.f32.xlu0 %v2740_v48  ;;  %2744 = vadd.xlane.f32.xlu1 %v2743_v31 }
 0x43e   :  { %2747 = vadd.xlane.f32.xlu1 %v2746_v11 }
 0x4c3   :  { %v2739_v2 = vpop.xlane.xlu0 %2738 }
 0x4c7   :  { %v2742_v34 = vpop.xlane.xlu0 %2741  ;;  %v2745_v62 = vpop.xlane.xlu1 %2744 }
 0x4c8   :  { %v2749_v16 = vadd.f32 %v2742_v34, %v2739_v2 }
 0x4ca   :  { %v2750_v51 = vrot.slane %v2749_v16, 4 }
 0x4cb   :  { %v2748_v29 = vpop.xlane.xlu1 %2747 }
 0x4cc   :  { %v2751_v23 = vadd.f32 %v2750_v51, %v2749_v16  ;;  %v2756_v52 = vadd.f32 %v2748_v29, %v2745_v62 }
 0x4ce   :  { %v2752_v0 = vrot.slane %v2751_v23, 2  ;;  %v2757_v36 = vrot.slane %v2756_v52, 4 }
 0x4d0   :  { %v2753_v5 = vadd.f32 %v2752_v0, %v2751_v23  ;;  %v2758_v12 = vadd.f32 %v2757_v36, %v2756_v52 }
 0x4d2   :  { %v2754_v60 = vrot.slane %v2753_v5, 1  ;;  %v2759_v30 = vrot.slane %v2758_v12, 2 }
 0x4d4   :  { %v2755_v32 = vadd.f32 %v2754_v60, %v2753_v5  ;;  %v2760_v46 = vadd.f32 %v2759_v30, %v2758_v12 }
 0x4d6   :  { %v2761_v15 = vrot.slane %v2760_v46, 1  ;;  %v2763_v38 = vmul.f32 0.0078125, %v2755_v32 }
 0x4d8   :  { %v2762_v26 = vadd.f32 %v2761_v15, %v2760_v46  ;;  %v2765_v45 = vsub.f32 %v2714_v57, %v2763_v38  ;;  %v2766_v14 = vsub.f32 %v3191_v47, %v2763_v38  ;;  %v2832_v47 = vld [vmem:[%s5427_s3 + $0x18] sm:$0xff] }
 0x4da   :  { %v2769_v21 = vmul.f32 %v2765_v45, %v2765_v45  ;;  %v2770_v25 = vmul.f32 %v2766_v14, %v2766_v14  ;;  %v2764_v40 = vmul.f32 0.0078125, %v2762_v26 }
 0x4dc   :  { %v2773_v42 = vsel %vm2736_vm1, %v2769_v21, 0.0  ;;  %v2776_v8 = vsel %vm2736_vm1, %v2770_v25, 0.0  ;;  %v2768_v55 = vsub.f32 %v3194_v22, %v2764_v40  ;;  %v2767_v17 = vsub.f32 %v2726_v35, %v2764_v40  ;;  %v2833_v22 = vld [vmem:[%s5427_s3 + $0x20] sm:$0xff]  ;;  %v2834_v35 = vld [vmem:[%s5427_s3 + $0x28] sm:$0xff] }
 0x4dd   :  { %2774 = vadd.xlane.f32.xlu0 %v2773_v42  ;;  %2777 = vadd.xlane.f32.xlu1 %v2776_v8 }
 0x4de   :  { %v2772_v54 = vmul.f32 %v2768_v55, %v2768_v55  ;;  %v2771_v61 = vmul.f32 %v2767_v17, %v2767_v17 }
 0x4e0   :  { %v2782_v1 = vsel %vm2736_vm1, %v2772_v54, 0.0  ;;  %v2779_v43 = vsel %vm2736_vm1, %v2771_v61, 0.0 }
 0x4e1   :  { %2783 = vadd.xlane.f32.xlu1 %v2782_v1  ;;  %2780 = vadd.xlane.f32.xlu0 %v2779_v43 }
 0x56a   :  { %v2775_v13 = vpop.xlane.xlu0 %2774  ;;  %v2778_v56 = vpop.xlane.xlu1 %2777 }
 0x56b   :  { %v2785_v50 = vadd.f32 %v2778_v56, %v2775_v13 }
 0x56d   :  { %v2786_v9 = vrot.slane %v2785_v50, 4 }
 0x56e   :  { %v2781_v24 = vpop.xlane.xlu0 %2780  ;;  %v2784_v20 = vpop.xlane.xlu1 %2783 }
 0x56f   :  { %v2787_v53 = vadd.f32 %v2786_v9, %v2785_v50  ;;  %v2792_v18 = vadd.f32 %v2784_v20, %v2781_v24 }
 0x571   :  { %v2788_v6 = vrot.slane %v2787_v53, 2  ;;  %v2793_v19 = vrot.slane %v2792_v18, 4 }
 0x573   :  { %v2789_v28 = vadd.f32 %v2788_v6, %v2787_v53  ;;  %v2794_v49 = vadd.f32 %v2793_v19, %v2792_v18 }
 0x575   :  { %v2790_v27 = vrot.slane %v2789_v28, 1  ;;  %v2795_v41 = vrot.slane %v2794_v49, 2 }
 0x577   :  { %v2791_v10 = vadd.f32 %v2790_v27, %v2789_v28  ;;  %v2796_v37 = vadd.f32 %v2795_v41, %v2794_v49 }
 0x579   :  { %v2799_v4 = vmul.f32 0.0078125, %v2791_v10  ;;  %v2797_v44 = vrot.slane %v2796_v37, 1 }
 0x57b   :  { %v2801_v3 = vadd.f32 1e-05, %v2799_v4  ;;  %v2798_v33 = vadd.f32 %v2797_v44, %v2796_v37 }
 0x57d   :  { %3672 = vrsqrt.f32 %v2801_v3  ;;  %v2800_v58 = vmul.f32 0.0078125, %v2798_v33 }
 0x57f   :  { %v2802_v39 = vadd.f32 1e-05, %v2800_v58 }
 0x581   :  { %3674 = vrsqrt.f32 %v2802_v39 }
 0x587   :  { %v3673_v59 = vpop.eup %3672 }
 0x588   :  { %v2805_v57 = vmul.f32 %v3673_v59, %v2765_v45  ;;  %v2806_v63 = vmul.f32 %v3673_v59, %v2766_v14 }
 0x58a   :  { %v2812_v48 = vmul.f32 %v2831_v7, %v2805_v57  ;;  %v2813_v31 = vmul.f32 %v2832_v47, %v2806_v63 }
 0x58b   :  { %v3675_v11 = vpop.eup %3674 }
 0x58c   :  { %v2819_v2 = vadd.f32 %v2833_v22, %v2812_v48  ;;  %v2820_v34 = vadd.f32 %v2834_v35, %v2813_v31  ;;  %v2807_v62 = vmul.f32 %v3675_v11, %v2767_v17  ;;  %v2808_v16 = vmul.f32 %v3675_v11, %v2768_v55 }
 0x58e   :  { %2823 = vst.msk [vmem:[%s5428_s4] sm:$0xff] %vm2736_vm1, %v2819_v2  ;;  %2824 = vst.msk [vmem:[%s5428_s4 + $0x8] sm:$0xff] %vm2736_vm1, %v2820_v34  ;;  %v2814_v51 = vmul.f32 %v2831_v7, %v2807_v62  ;;  %v2815_v29 = vmul.f32 %v2832_v47, %v2808_v16 }
 0x590   :  { %v2821_v23 = vadd.f32 %v2833_v22, %v2814_v51  ;;  %v2822_v52 = vadd.f32 %v2834_v35, %v2815_v29 }
 0x592   :  { %2825 = vst.msk [vmem:[%s5428_s4 + $0x10] sm:$0xff] %vm2736_vm1, %v2821_v23  ;;  %2826 = vst.msk [vmem:[%s5428_s4 + $0x18] sm:$0xff] %vm2736_vm1, %v2822_v52 }

</bundles_post_ra>
